<compile_context>
chip_gen: v7x
topology: tpu7x:2x2x1
jax: 0.10.0
libtpu: 0.0.40
codegen_flags: <defaults>
</compile_context>

<pallas_src>
import functools
import math

import jax
import jax.numpy as jnp
from jax.experimental import pallas as pl
from jax.experimental.pallas import tpu as pltpu

EPS = 1e-5  # torch.nn.LayerNorm default


# ---------------------------------------------------------------------------
# in-kernel helpers (f32 math)
# ---------------------------------------------------------------------------
def _layernorm(x, g, b):
    mu = jnp.mean(x, axis=-1, keepdims=True)
    var = jnp.mean((x - mu) ** 2, axis=-1, keepdims=True)
    return (x - mu) * jax.lax.rsqrt(var + EPS) * g + b


def _quick_gelu(x):
    return x * jax.nn.sigmoid(1.702 * x)


# ---------------------------------------------------------------------------
# Fused transformer kernel: grid = (batch_block, layer)
# ---------------------------------------------------------------------------
def _tvi_kernel(n_head, q_tile,
                x_ref, mask_ref,
                ln1_g, ln1_b, wqkv, bqkv, wo, bo,
                ln2_g, ln2_b, wfc, bfc, wproj, bproj,
                lnp_g, lnp_b, wd, bd,
                emb_ref, pool_ref):
    layer = pl.program_id(1)
    n_layers = pl.num_programs(1)
    bf16 = jnp.bfloat16
    f32 = jnp.float32

    TB, L, D = emb_ref.shape
    H = n_head
    hd = D // H
    TQ = q_tile
    nq = L // TQ

    # Layer 0: load this batch block's activations into the resident output
    # block; it stays in VMEM for the whole layer axis.
    @pl.when(layer == 0)
    def _():
        emb_ref[...] = x_ref[...]

    x = emb_ref[...]                      # (TB, L, D) f32, resident across layers
    mask = mask_ref[...]                  # (TB, 1, L) additive key bias

    # ---------------- fused QKV projection (one lane-dense MXU matmul) --------
    xn = _layernorm(x, ln1_g[...], ln1_b[...])
    qkv = jnp.dot(xn.reshape(TB * L, D).astype(bf16), wqkv[0],
                  preferred_element_type=f32) + bqkv[0]          # (TB*L, 3D)
    qkv = qkv.reshape(TB, L, 3 * D)
    q = qkv[:, :, :D].astype(bf16)        # 1/sqrt(hd) already folded into wq/bq
    k = qkv[:, :, D:2 * D].astype(bf16)
    v = qkv[:, :, 2 * D:].astype(bf16)

    pooled_src = None
    # Static query-row tiling: bounds scores to (TB, TQ, L) per head and the
    # MLP intermediate to (TB, TQ, 4D); rows are independent after K/V exist.
    for t in range(nq):
        sl = slice(t * TQ, (t + 1) * TQ)
        x_t = x[:, sl, :]                                        # (TB, TQ, D)

        # -------- attention for this query tile (static head loop) ----------
        o_parts = []
        for h in range(H):
            hs = slice(h * hd, (h + 1) * hd)
            s = jnp.einsum("bqd,bkd->bqk", q[:, sl, hs], k[:, :, hs],
                           preferred_element_type=f32)           # (TB, TQ, L)
            s = s + mask
            s = s - jnp.max(s, axis=-1, keepdims=True)
            p = jnp.exp(s)
            p = p * pl.reciprocal(jnp.sum(p, axis=-1, keepdims=True),
                                  approx=True)
            o_parts.append(
                jnp.einsum("bqk,bkd->bqd", p.astype(bf16), v[:, :, hs],
                           preferred_element_type=f32).astype(bf16))
        o = jnp.concatenate(o_parts, axis=-1)                    # (TB, TQ, D)

        # single K=D output projection on the head-concatenated result
        attn = jnp.dot(o.reshape(TB * TQ, D), wo[0],
                       preferred_element_type=f32) + bo[0]
        x_t = x_t + attn.reshape(TB, TQ, D)

        # -------- MLP: x + c_proj(QuickGELU(c_fc(ln_2(x)))) ------------------
        xn2 = _layernorm(x_t, ln2_g[...], ln2_b[...])
        h1 = jnp.dot(xn2.reshape(TB * TQ, D).astype(bf16), wfc[0],
                     preferred_element_type=f32) + bfc[0]        # (TB*TQ, 4D)
        h1 = _quick_gelu(h1)
        h2 = jnp.dot(h1.astype(bf16), wproj[0],
                     preferred_element_type=f32) + bproj[0]
        x_t = x_t + h2.reshape(TB, TQ, D)

        emb_ref[:, sl, :] = x_t
        if t == 0:
            pooled_src = x_t[:, 0:1, :]                          # position 0

    # ---------------- FusionPooler folded into the last layer -----------------
    @pl.when(layer == n_layers - 1)
    def _():
        xp = _layernorm(pooled_src, lnp_g[...], lnp_b[...])      # (TB, 1, D)
        y = jnp.dot(xp.reshape(TB, D).astype(bf16), wd[...],
                    preferred_element_type=f32) + bd[...]
        pool_ref[...] = _quick_gelu(y).reshape(TB, 1, D)


# ---------------------------------------------------------------------------
# Parameter packing (host-side, plain JAX)
# ---------------------------------------------------------------------------
def _pack_params(params, n_head):
    layers = params["layers"]
    D = layers[0]["wq"].shape[0]
    hd = D // n_head
    scale = 1.0 / math.sqrt(hd)
    f32, bf16 = jnp.float32, jnp.bfloat16

    def stk(name):
        return jnp.stack([lay[name] for lay in layers], axis=0)

    # fused QKV weight (NL, D, 3D) with the 1/sqrt(hd) scale folded into wq/bq
    wqkv = jnp.stack([
        jnp.concatenate([(l["wq"].astype(f32) * scale).astype(bf16),
                         l["wk"].astype(bf16),
                         l["wv"].astype(bf16)], axis=1)
        for l in layers], axis=0)
    bqkv = jnp.stack([
        jnp.concatenate([l["bq"].astype(f32) * scale,
                         l["bk"].astype(f32),
                         l["bv"].astype(f32)], axis=1)
        for l in layers], axis=0)
    wo = jnp.stack([l["wo"].astype(bf16) for l in layers], axis=0)  # (NL, D, D)

    packed = dict(
        ln1_g=stk("ln1_g"), ln1_b=stk("ln1_b"),
        wqkv=wqkv, bqkv=bqkv, wo=wo, bo=stk("bo"),
        ln2_g=stk("ln2_g"), ln2_b=stk("ln2_b"),
        wfc=stk("wfc"), bfc=stk("bfc"),
        wproj=stk("wproj"), bproj=stk("bproj"),
    )
    packed.update({k: params["pooler"][k] for k in ("lnp_g", "lnp_b", "wd", "bd")})
    return packed


def _largest_divisor_leq(total, cap):
    b = max(1, min(int(cap), int(total)))
    while total % b:
        b -= 1
    return b


def _vmem_capacity_bytes():
    try:
        info = pltpu.get_tpu_info()
        return int(getattr(info, "vmem_capacity_bytes", 128 << 20))
    except Exception:
        return 128 << 20


# ---------------------------------------------------------------------------
# Full forward (single pallas_call)
# ---------------------------------------------------------------------------
def text_video_integration_transformer(concat_input, concat_mask, params, n_head,
                                        *, batch_block=None, q_tile=None):
    B, L, D = concat_input.shape
    assert D % n_head == 0
    d_ff = 4 * D

    if concat_mask is None:
        concat_mask = jnp.ones((B, L), dtype=jnp.float32)
    # compact additive key mask (B, 1, L): (1 - m) * -1e6  (never (B, L, L))
    mask_add = ((1.0 - concat_mask.astype(jnp.float32)) * -1000000.0)[:, None, :]

    packed = _pack_params(params, n_head)
    NL = packed["ln1_g"].shape[0]

    # ---- batch blocking: amortize per-layer weight streaming over TB seqs ----
    if batch_block is None:
        tb_cap = max(1, min(8, (24 << 20) // max(1, 16 * L * D)))
        TB = _largest_divisor_leq(B, tb_cap)
    else:
        TB = int(batch_block)
        assert B % TB == 0
    # ---- query-row tile (bounds scores / MLP intermediates) ----
    if q_tile is None:
        TQ = L if L <= 256 else _largest_divisor_leq(L, 256)
        if TQ < 64:
            TQ = L  # TODO(synk): pad L for prime-ish lengths instead
    else:
        TQ = int(q_tile)
        assert L % TQ == 0

    weight_names = ("ln1_g", "ln1_b", "wqkv", "bqkv", "wo", "bo",
                    "ln2_g", "ln2_b", "wfc", "bfc", "wproj", "bproj")
    pool_names = ("lnp_g", "lnp_b", "wd", "bd")

    def layer_spec(shape):
        nd = len(shape)
        return pl.BlockSpec(shape, lambda b, l, _nd=nd: (l,) + (0,) * (_nd - 1))

    def const_spec(shape):
        nd = len(shape)
        return pl.BlockSpec(shape, lambda b, l, _nd=nd: (0,) * _nd)

    in_specs = [
        pl.BlockSpec((TB, L, D), lambda b, l: (b, 0, 0)),   # x
        pl.BlockSpec((TB, 1, L), lambda b, l: (b, 0, 0)),   # mask_add
        layer_spec((1, 1, D)),            # ln1_g
        layer_spec((1, 1, D)),            # ln1_b
        layer_spec((1, D, 3 * D)),        # wqkv (fused, lane-dense)
        layer_spec((1, 1, 3 * D)),        # bqkv
        layer_spec((1, D, D)),            # wo
        layer_spec((1, 1, D)),            # bo
        layer_spec((1, 1, D)),            # ln2_g
        layer_spec((1, 1, D)),            # ln2_b
        layer_spec((1, D, d_ff)),         # wfc
        layer_spec((1, 1, d_ff)),         # bfc
        layer_spec((1, d_ff, D)),         # wproj
        layer_spec((1, 1, D)),            # bproj
        const_spec((1, D)), const_spec((1, D)),   # lnp_g, lnp_b
        const_spec((D, D)), const_spec((1, D)),   # wd, bd
    ]
    args = [concat_input.astype(jnp.float32), mask_add]
    args += [packed[n] for n in weight_names]
    args += [packed[n] for n in pool_names]

    out_shape = (jax.ShapeDtypeStruct((B, L, D), jnp.float32),
                 jax.ShapeDtypeStruct((B, 1, D), jnp.float32))
    out_specs = (pl.BlockSpec((TB, L, D), lambda b, l: (b, 0, 0)),
                 pl.BlockSpec((TB, 1, D), lambda b, l: (b, 0, 0)))

    # ---- VMEM budget (double-buffered layer weights + resident activations
    #      + all in-kernel intermediates), generation-aware cap ----
    def nbytes(a):
        return a.size * a.dtype.itemsize
    per_layer_w = sum(nbytes(packed[n]) // NL for n in weight_names)
    pool_w = sum(nbytes(packed[n]) for n in pool_names)
    act_full = TB * L * D
    act_tile = TB * TQ * D
    interm = (act_full * (4 + 2)                 # xn f32 + bf16 copy
              + TB * L * 3 * D * (4 + 2)         # qkv f32 + q/k/v bf16
              + 2 * TB * TQ * L * 4              # scores / probs (one head live)
              + act_tile * 20                    # x_t, o, attn, xn2, h2, ...
              + TB * TQ * d_ff * (4 + 2))        # h1 f32 + bf16
    est = 2 * per_layer_w + pool_w + 3 * act_full * 4 + interm + (8 << 20)
    phys = _vmem_capacity_bytes()
    cap = max(32 << 20, min(phys - (12 << 20), 100 << 20))
    vmem_limit = int(min(max(est, 32 << 20), cap))

    # ---- advisory cost estimate for the XLA scheduler ----
    flops = int(B * NL * (2 * L * D * (12 * D + 2 * L)) + 2 * B * D * D)
    transc = int(B * NL * (n_head * L * L + L * d_ff) + B * D)
    bytes_acc = int((sum(nbytes(packed[n]) for n in weight_names)) * (B // TB)
                    + pool_w + 2 * B * L * D * 4 + B * L * 4 + B * D * 4)
    cost = pl.CostEstimate(flops=flops, transcendentals=transc,
                           bytes_accessed=bytes_acc)

    emb, pooled = pl.pallas_call(
        functools.partial(_tvi_kernel, n_head, TQ),
        out_shape=out_shape,
        grid=(B // TB, NL),
        in_specs=in_specs,
        out_specs=out_specs,
        compiler_params=pltpu.CompilerParams(
            dimension_semantics=("parallel", "arbitrary"),
            vmem_limit_bytes=vmem_limit),
        cost_estimate=cost,
    )(*args)
    return emb, pooled[:, 0, :]


# ---------------------------------------------------------------------------
# Deterministic parameter init (matmul weights stored in bf16)
# ---------------------------------------------------------------------------
def init_params(key, num_layers, d_model):
    d_ff = 4 * d_model
    bf16 = jnp.bfloat16
    layers = []
    for li in range(num_layers):
        k = jax.random.fold_in(key, li)
        ks = jax.random.split(k, 16)
        nrm = lambda i, shp: 0.02 * jax.random.normal(ks[i], shp, jnp.float32)
        layers.append(dict(
            ln1_g=1.0 + 0.05 * jax.random.normal(ks[10], (1, d_model), jnp.float32),
            ln1_b=nrm(11, (1, d_model)),
            wq=nrm(0, (d_model, d_model)).astype(bf16),
            wk=nrm(1, (d_model, d_model)).astype(bf16),
            wv=nrm(2, (d_model, d_model)).astype(bf16),
            bq=nrm(6, (1, d_model)),
            bk=nrm(7, (1, d_model)),
            bv=nrm(8, (1, d_model)),
            wo=nrm(3, (d_model, d_model)).astype(bf16),
            bo=nrm(9, (1, d_model)),
            ln2_g=1.0 + 0.05 * jax.random.normal(ks[12], (1, d_model), jnp.float32),
            ln2_b=nrm(13, (1, d_model)),
            wfc=nrm(4, (d_model, d_ff)).astype(bf16),
            bfc=nrm(14, (1, d_ff)),
            wproj=nrm(5, (d_ff, d_model)).astype(bf16),
            bproj=nrm(15, (1, d_model)),
        ))
    kp = jax.random.fold_in(key, 10_000)
    kps = jax.random.split(kp, 4)
    pooler = dict(
        lnp_g=1.0 + 0.05 * jax.random.normal(kps[0], (1, d_model), jnp.float32),
        lnp_b=0.02 * jax.random.normal(kps[1], (1, d_model), jnp.float32),
        wd=(0.02 * jax.random.normal(kps[2], (d_model, d_model), jnp.float32)
            ).astype(bf16),
        bd=0.02 * jax.random.normal(kps[3], (1, d_model), jnp.float32),
    )
    return {"layers": layers, "pooler": pooler}


# ---------------------------------------------------------------------------
# Pure-JAX reference (same bf16-operand / f32-accumulate recipe)
# ---------------------------------------------------------------------------
def _ref_forward(x, mask, params, n_head):
    B, L, D = x.shape
    hd = D // n_head
    bf = jnp.bfloat16
    mask_add = (1.0 - mask.astype(jnp.float32)) * -1000000.0     # (B, L)

    def ln(v, g, b):
        mu = v.mean(-1, keepdims=True)
        var = ((v - mu) ** 2).mean(-1, keepdims=True)
        return (v - mu) * jax.lax.rsqrt(var + EPS) * g + b

    def qg(v):
        return v * jax.nn.sigmoid(1.702 * v)

    def mm(a, w):
        return jnp.dot(a.astype(bf), w, preferred_element_type=jnp.float32)

    x = x.astype(jnp.float32)
    for lay in params["layers"]:
        xn = ln(x, lay["ln1_g"], lay["ln1_b"])
        q = mm(xn, lay["wq"]) + lay["bq"]
        k = mm(xn, lay["wk"]) + lay["bk"]
        v = mm(xn, lay["wv"]) + lay["bv"]
        q = q.reshape(B, L, n_head, hd).transpose(0, 2, 1, 3)
        k = k.reshape(B, L, n_head, hd).transpose(0, 2, 1, 3)
        v = v.reshape(B, L, n_head, hd).transpose(0, 2, 1, 3)
        s = jnp.einsum("bhqd,bhkd->bhqk", q.astype(bf), k.astype(bf),
                       preferred_element_type=jnp.float32) / math.sqrt(hd)
        s = s + mask_add[:, None, None, :]
        p = jax.nn.softmax(s, axis=-1)
        o = jnp.einsum("bhqk,bhkd->bhqd", p.astype(bf), v.astype(bf),
                       preferred_element_type=jnp.float32)
        o = o.transpose(0, 2, 1, 3).reshape(B, L, D)
        x = x + mm(o, lay["wo"]) + lay["bo"]
        xn2 = ln(x, lay["ln2_g"], lay["ln2_b"])
        h1 = qg(mm(xn2, lay["wfc"]) + lay["bfc"])
        x = x + mm(h1, lay["wproj"]) + lay["bproj"]

    pool = params["pooler"]
    pooled = qg(mm(ln(x, pool["lnp_g"], pool["lnp_b"])[:, 0], pool["wd"])
                + pool["bd"])
    return x, pooled


# ---------------------------------------------------------------------------
if __name__ == "__main__":
    B, L, D, H, NUM_LAYERS = 2, 8, 32, 4, 2

    key = jax.random.PRNGKey(0)
    k_in, k_par = jax.random.split(key)
    concat_input = jax.random.normal(k_in, (B, L, D), jnp.float32)
    # exercise the additive mask: last two positions of batch 1 are padding
    concat_mask = jnp.ones((B, L), jnp.float32).at[1, 6:].set(0.0)

    params = init_params(k_par, NUM_LAYERS, D)
    ref_emb, ref_pooled = _ref_forward(concat_input, concat_mask, params, H)

    def check(emb, pooled):
        emb = jax.block_until_ready(emb)
        pooled = jax.block_until_ready(pooled)
        assert emb.shape == (B, L, D) and pooled.shape == (B, D)
        assert jnp.allclose(emb, ref_emb, atol=1e-2, rtol=1e-2), \
            float(jnp.max(jnp.abs(emb - ref_emb)))
        assert jnp.allclose(pooled, ref_pooled, atol=1e-2, rtol=1e-2), \
            float(jnp.max(jnp.abs(pooled - ref_pooled)))

    # Path 1: default tiling (whole batch in one block, single query tile).
    emb, pooled = text_video_integration_transformer(
        concat_input, concat_mask, params, H)
    check(emb, pooled)

    # Path 2: exercise batch blocking (TB=1) and multi-tile query loop (TQ=4).
    emb2, pooled2 = text_video_integration_transformer(
        concat_input, concat_mask, params, H, batch_block=1, q_tile=4)
    check(emb2, pooled2)

    print("KERNEL_OK")
</pallas_src>

<mosaic_0001>
module attributes {stable_mosaic.version = 11 : i64} {
  func.func @_tvi_kernel(%arg0: i32, %arg1: i32, %arg2: memref<2x8x32xf32, #tpu.memory_space<vmem>>, %arg3: memref<2x1x8xf32, #tpu.memory_space<vmem>>, %arg4: memref<1x1x32xf32, #tpu.memory_space<vmem>>, %arg5: memref<1x1x32xf32, #tpu.memory_space<vmem>>, %arg6: memref<1x32x96xbf16, #tpu.memory_space<vmem>>, %arg7: memref<1x1x96xf32, #tpu.memory_space<vmem>>, %arg8: memref<1x32x32xbf16, #tpu.memory_space<vmem>>, %arg9: memref<1x1x32xf32, #tpu.memory_space<vmem>>, %arg10: memref<1x1x32xf32, #tpu.memory_space<vmem>>, %arg11: memref<1x1x32xf32, #tpu.memory_space<vmem>>, %arg12: memref<1x32x128xbf16, #tpu.memory_space<vmem>>, %arg13: memref<1x1x128xf32, #tpu.memory_space<vmem>>, %arg14: memref<1x128x32xbf16, #tpu.memory_space<vmem>>, %arg15: memref<1x1x32xf32, #tpu.memory_space<vmem>>, %arg16: memref<1x32xf32, #tpu.memory_space<vmem>>, %arg17: memref<1x32xf32, #tpu.memory_space<vmem>>, %arg18: memref<32x32xbf16, #tpu.memory_space<vmem>>, %arg19: memref<1x32xf32, #tpu.memory_space<vmem>>, %arg20: memref<2x8x32xf32, #tpu.memory_space<vmem>>, %arg21: memref<2x1x32xf32, #tpu.memory_space<vmem>>) attributes {dimension_semantics = [#tpu.dimension_semantics<parallel>, #tpu.dimension_semantics<arbitrary>], iteration_bounds = array<i64: 1, 2>, scalar_prefetch = 0 : i64, scratch_operands = 0 : i64, tpu.core_type = #tpu.core_type<tc>, window_params = [{transform_indices = @transform_0, window_bounds = array<i64: 2, 8, 32>}, {transform_indices = @transform_1, window_bounds = array<i64: 2, 1, 8>}, {transform_indices = @transform_2, window_bounds = array<i64: 1, 1, 32>}, {transform_indices = @transform_3, window_bounds = array<i64: 1, 1, 32>}, {transform_indices = @transform_4, window_bounds = array<i64: 1, 32, 96>}, {transform_indices = @transform_5, window_bounds = array<i64: 1, 1, 96>}, {transform_indices = @transform_6, window_bounds = array<i64: 1, 32, 32>}, {transform_indices = @transform_7, window_bounds = array<i64: 1, 1, 32>}, {transform_indices = @transform_8, window_bounds = array<i64: 1, 1, 32>}, {transform_indices = @transform_9, window_bounds = array<i64: 1, 1, 32>}, {transform_indices = @transform_10, window_bounds = array<i64: 1, 32, 128>}, {transform_indices = @transform_11, window_bounds = array<i64: 1, 1, 128>}, {transform_indices = @transform_12, window_bounds = array<i64: 1, 128, 32>}, {transform_indices = @transform_13, window_bounds = array<i64: 1, 1, 32>}, {pipeline_mode = #tpu.pipeline_mode<synchronous>, transform_indices = @transform_14, window_bounds = array<i64: 1, 32>}, {pipeline_mode = #tpu.pipeline_mode<synchronous>, transform_indices = @transform_15, window_bounds = array<i64: 1, 32>}, {pipeline_mode = #tpu.pipeline_mode<synchronous>, transform_indices = @transform_16, window_bounds = array<i64: 32, 32>}, {pipeline_mode = #tpu.pipeline_mode<synchronous>, transform_indices = @transform_17, window_bounds = array<i64: 1, 32>}, {transform_indices = @transform_18, window_bounds = array<i64: 2, 8, 32>}, {transform_indices = @transform_19, window_bounds = array<i64: 2, 1, 32>}]} {
    %c0_i32 = arith.constant 0 : i32
    %0 = arith.cmpi eq, %arg1, %c0_i32 : i32
    %1 = arith.extui %0 : i1 to i32
    %c0_i32_0 = arith.constant 0 : i32
    %2 = arith.cmpi ne, %1, %c0_i32_0 : i32
    scf.if %2 {
      %c0_77 = arith.constant 0 : index
      %c0_78 = arith.constant 0 : index
      %c0_79 = arith.constant 0 : index
      %188 = vector.load %arg2[%c0_77, %c0_78, %c0_79] : memref<2x8x32xf32, #tpu.memory_space<vmem>>, vector<2x8x32xf32>
      %c0_80 = arith.constant 0 : index
      %c0_81 = arith.constant 0 : index
      %c0_82 = arith.constant 0 : index
      %189 = vector.load %arg20[%c0_80, %c0_81, %c0_82] : memref<2x8x32xf32, #tpu.memory_space<vmem>>, vector<2x8x32xf32>
      tpu.vector_store %arg20[%c0_80, %c0_81, %c0_82], %188 {strides = array<i32>} : memref<2x8x32xf32, #tpu.memory_space<vmem>>, vector<2x8x32xf32>,
    } else {
    }
    %c0 = arith.constant 0 : index
    %c0_1 = arith.constant 0 : index
    %c0_2 = arith.constant 0 : index
    %3 = vector.load %arg20[%c0, %c0_1, %c0_2] : memref<2x8x32xf32, #tpu.memory_space<vmem>>, vector<2x8x32xf32>
    %c0_3 = arith.constant 0 : index
    %c0_4 = arith.constant 0 : index
    %c0_5 = arith.constant 0 : index
    %4 = vector.load %arg3[%c0_3, %c0_4, %c0_5] : memref<2x1x8xf32, #tpu.memory_space<vmem>>, vector<2x1x8xf32>
    %c0_6 = arith.constant 0 : index
    %c0_7 = arith.constant 0 : index
    %c0_8 = arith.constant 0 : index
    %5 = vector.load %arg4[%c0_6, %c0_7, %c0_8] : memref<1x1x32xf32, #tpu.memory_space<vmem>>, vector<1x1x32xf32>
    %c0_9 = arith.constant 0 : index
    %c0_10 = arith.constant 0 : index
    %c0_11 = arith.constant 0 : index
    %6 = vector.load %arg5[%c0_9, %c0_10, %c0_11] : memref<1x1x32xf32, #tpu.memory_space<vmem>>, vector<1x1x32xf32>
    %cst = arith.constant dense<0.000000e+00> : vector<2x8xf32>
    %7 = vector.multi_reduction <add>, %3, %cst [2] : vector<2x8x32xf32> to vector<2x8xf32>
    %8 = vector.shape_cast %7 : vector<2x8xf32> to vector<2x8x1xf32>
    %cst_12 = arith.constant 3.200000e+01 : f32
    %9 = vector.broadcast %cst_12 : f32 to vector<2x8x1xf32>
    %10 = arith.divf %8, %9 : vector<2x8x1xf32>
    %11 = vector.broadcast %10 : vector<2x8x1xf32> to vector<2x8x32xf32>
    %12 = arith.subf %3, %11 : vector<2x8x32xf32>
    %13 = arith.mulf %12, %12 : vector<2x8x32xf32>
    %cst_13 = arith.constant dense<0.000000e+00> : vector<2x8xf32>
    %14 = vector.multi_reduction <add>, %13, %cst_13 [2] : vector<2x8x32xf32> to vector<2x8xf32>
    %15 = vector.shape_cast %14 : vector<2x8xf32> to vector<2x8x1xf32>
    %cst_14 = arith.constant 3.200000e+01 : f32
    %16 = vector.broadcast %cst_14 : f32 to vector<2x8x1xf32>
    %17 = arith.divf %15, %16 : vector<2x8x1xf32>
    %18 = vector.broadcast %10 : vector<2x8x1xf32> to vector<2x8x32xf32>
    %19 = arith.subf %3, %18 : vector<2x8x32xf32>
    %cst_15 = arith.constant 9.99999974E-6 : f32
    %20 = vector.broadcast %cst_15 : f32 to vector<2x8x1xf32>
    %21 = arith.addf %17, %20 : vector<2x8x1xf32>
    %22 = math.rsqrt %21 : vector<2x8x1xf32>
    %23 = vector.broadcast %22 : vector<2x8x1xf32> to vector<2x8x32xf32>
    %24 = arith.mulf %19, %23 : vector<2x8x32xf32>
    %25 = vector.broadcast %5 : vector<1x1x32xf32> to vector<2x8x32xf32>
    %26 = arith.mulf %24, %25 : vector<2x8x32xf32>
    %27 = vector.broadcast %6 : vector<1x1x32xf32> to vector<2x8x32xf32>
    %28 = arith.addf %26, %27 : vector<2x8x32xf32>
    %29 = vector.shape_cast %28 : vector<2x8x32xf32> to vector<16x32xf32>
    %30 = arith.truncf %29 : vector<16x32xf32> to vector<16x32xbf16>
    %c0_16 = arith.constant 0 : index
    %c0_17 = arith.constant 0 : index
    %c0_18 = arith.constant 0 : index
    %31 = vector.load %arg6[%c0_16, %c0_17, %c0_18] : memref<1x32x96xbf16, #tpu.memory_space<vmem>>, vector<1x32x96xbf16>
    %32 = vector.shape_cast %31 : vector<1x32x96xbf16> to vector<32x96xbf16>
    %cst_19 = arith.constant dense<0.000000e+00> : vector<16x96xf32>
    %33 = tpu.matmul %30, %32, %cst_19 {dimension_numbers = #tpu.dot_dimension_numbers<[1], [0], [0], [1], [0, 0, 1, 1], [], []>} : vector<16x32xbf16>, vector<32x96xbf16>, vector<16x96xf32> -> vector<16x96xf32>
    %c0_20 = arith.constant 0 : index
    %c0_21 = arith.constant 0 : index
    %c0_22 = arith.constant 0 : index
    %34 = vector.load %arg7[%c0_20, %c0_21, %c0_22] : memref<1x1x96xf32, #tpu.memory_space<vmem>>, vector<1x1x96xf32>
    %35 = vector.shape_cast %34 : vector<1x1x96xf32> to vector<1x96xf32>
    %36 = vector.broadcast %35 : vector<1x96xf32> to vector<16x96xf32>
    %37 = arith.addf %33, %36 : vector<16x96xf32>
    %38 = vector.shape_cast %37 : vector<16x96xf32> to vector<2x8x96xf32>
    %39 = vector.extract_strided_slice %38 {offsets = [0, 0, 0], sizes = [2, 8, 32], strides = [1, 1, 1]} : vector<2x8x96xf32> to vector<2x8x32xf32>
    %40 = arith.truncf %39 : vector<2x8x32xf32> to vector<2x8x32xbf16>
    %41 = vector.extract_strided_slice %38 {offsets = [0, 0, 32], sizes = [2, 8, 32], strides = [1, 1, 1]} : vector<2x8x96xf32> to vector<2x8x32xf32>
    %42 = arith.truncf %41 : vector<2x8x32xf32> to vector<2x8x32xbf16>
    %43 = vector.extract_strided_slice %38 {offsets = [0, 0, 64], sizes = [2, 8, 32], strides = [1, 1, 1]} : vector<2x8x96xf32> to vector<2x8x32xf32>
    %44 = arith.truncf %43 : vector<2x8x32xf32> to vector<2x8x32xbf16>
    %45 = vector.extract_strided_slice %40 {offsets = [0, 0, 0], sizes = [2, 8, 8], strides = [1, 1, 1]} : vector<2x8x32xbf16> to vector<2x8x8xbf16>
    %46 = vector.extract_strided_slice %42 {offsets = [0, 0, 0], sizes = [2, 8, 8], strides = [1, 1, 1]} : vector<2x8x32xbf16> to vector<2x8x8xbf16>
    "tpu.trace_start"() <{level = 10 : i32, message = "bqd,bkd->bqk"}> : () -> ()
    %cst_23 = arith.constant dense<0.000000e+00> : vector<2x8x8xf32>
    %47 = tpu.matmul %45, %46, %cst_23 {dimension_numbers = #tpu.dot_dimension_numbers<[2], [2], [1], [1], [0, 0, 0, 1, 1, 1], [0], [0]>} : vector<2x8x8xbf16>, vector<2x8x8xbf16>, vector<2x8x8xf32> -> vector<2x8x8xf32>
    "tpu.trace_stop"() : () -> ()
    %48 = vector.broadcast %4 : vector<2x1x8xf32> to vector<2x8x8xf32>
    %49 = arith.addf %47, %48 : vector<2x8x8xf32>
    %cst_24 = arith.constant dense<0xFF800000> : vector<2x8xf32>
    %50 = vector.multi_reduction <maximumf>, %49, %cst_24 [2] : vector<2x8x8xf32> to vector<2x8xf32>
    %51 = vector.shape_cast %50 : vector<2x8xf32> to vector<2x8x1xf32>
    %52 = vector.broadcast %51 : vector<2x8x1xf32> to vector<2x8x8xf32>
    %53 = arith.subf %49, %52 : vector<2x8x8xf32>
    %54 = math.exp %53 : vector<2x8x8xf32>
    %cst_25 = arith.constant dense<0.000000e+00> : vector<2x8xf32>
    %55 = vector.multi_reduction <add>, %54, %cst_25 [2] : vector<2x8x8xf32> to vector<2x8xf32>
    %56 = vector.shape_cast %55 : vector<2x8xf32> to vector<2x8x1xf32>
    %57 = tpu.reciprocal %56 {approx = true} : vector<2x8x1xf32> -> vector<2x8x1xf32>
    %58 = vector.broadcast %57 : vector<2x8x1xf32> to vector<2x8x8xf32>
    %59 = arith.mulf %54, %58 : vector<2x8x8xf32>
    %60 = arith.truncf %59 : vector<2x8x8xf32> to vector<2x8x8xbf16>
    %61 = vector.extract_strided_slice %44 {offsets = [0, 0, 0], sizes = [2, 8, 8], strides = [1, 1, 1]} : vector<2x8x32xbf16> to vector<2x8x8xbf16>
    "tpu.trace_start"() <{level = 10 : i32, message = "bqk,bkd->bqd"}> : () -> ()
    %cst_26 = arith.constant dense<0.000000e+00> : vector<2x8x8xf32>
    %62 = tpu.matmul %60, %61, %cst_26 {dimension_numbers = #tpu.dot_dimension_numbers<[2], [1], [1], [2], [0, 0, 0, 1, 1, 2], [0], [0]>} : vector<2x8x8xbf16>, vector<2x8x8xbf16>, vector<2x8x8xf32> -> vector<2x8x8xf32>
    "tpu.trace_stop"() : () -> ()
    %63 = arith.truncf %62 : vector<2x8x8xf32> to vector<2x8x8xbf16>
    %64 = vector.extract_strided_slice %40 {offsets = [0, 0, 8], sizes = [2, 8, 8], strides = [1, 1, 1]} : vector<2x8x32xbf16> to vector<2x8x8xbf16>
    %65 = vector.extract_strided_slice %42 {offsets = [0, 0, 8], sizes = [2, 8, 8], strides = [1, 1, 1]} : vector<2x8x32xbf16> to vector<2x8x8xbf16>
    "tpu.trace_start"() <{level = 10 : i32, message = "bqd,bkd->bqk"}> : () -> ()
    %cst_27 = arith.constant dense<0.000000e+00> : vector<2x8x8xf32>
    %66 = tpu.matmul %64, %65, %cst_27 {dimension_numbers = #tpu.dot_dimension_numbers<[2], [2], [1], [1], [0, 0, 0, 1, 1, 1], [0], [0]>} : vector<2x8x8xbf16>, vector<2x8x8xbf16>, vector<2x8x8xf32> -> vector<2x8x8xf32>
    "tpu.trace_stop"() : () -> ()
    %67 = vector.broadcast %4 : vector<2x1x8xf32> to vector<2x8x8xf32>
    %68 = arith.addf %66, %67 : vector<2x8x8xf32>
    %cst_28 = arith.constant dense<0xFF800000> : vector<2x8xf32>
    %69 = vector.multi_reduction <maximumf>, %68, %cst_28 [2] : vector<2x8x8xf32> to vector<2x8xf32>
    %70 = vector.shape_cast %69 : vector<2x8xf32> to vector<2x8x1xf32>
    %71 = vector.broadcast %70 : vector<2x8x1xf32> to vector<2x8x8xf32>
    %72 = arith.subf %68, %71 : vector<2x8x8xf32>
    %73 = math.exp %72 : vector<2x8x8xf32>
    %cst_29 = arith.constant dense<0.000000e+00> : vector<2x8xf32>
    %74 = vector.multi_reduction <add>, %73, %cst_29 [2] : vector<2x8x8xf32> to vector<2x8xf32>
    %75 = vector.shape_cast %74 : vector<2x8xf32> to vector<2x8x1xf32>
    %76 = tpu.reciprocal %75 {approx = true} : vector<2x8x1xf32> -> vector<2x8x1xf32>
    %77 = vector.broadcast %76 : vector<2x8x1xf32> to vector<2x8x8xf32>
    %78 = arith.mulf %73, %77 : vector<2x8x8xf32>
    %79 = arith.truncf %78 : vector<2x8x8xf32> to vector<2x8x8xbf16>
    %80 = vector.extract_strided_slice %44 {offsets = [0, 0, 8], sizes = [2, 8, 8], strides = [1, 1, 1]} : vector<2x8x32xbf16> to vector<2x8x8xbf16>
    "tpu.trace_start"() <{level = 10 : i32, message = "bqk,bkd->bqd"}> : () -> ()
    %cst_30 = arith.constant dense<0.000000e+00> : vector<2x8x8xf32>
    %81 = tpu.matmul %79, %80, %cst_30 {dimension_numbers = #tpu.dot_dimension_numbers<[2], [1], [1], [2], [0, 0, 0, 1, 1, 2], [0], [0]>} : vector<2x8x8xbf16>, vector<2x8x8xbf16>, vector<2x8x8xf32> -> vector<2x8x8xf32>
    "tpu.trace_stop"() : () -> ()
    %82 = arith.truncf %81 : vector<2x8x8xf32> to vector<2x8x8xbf16>
    %83 = vector.extract_strided_slice %40 {offsets = [0, 0, 16], sizes = [2, 8, 8], strides = [1, 1, 1]} : vector<2x8x32xbf16> to vector<2x8x8xbf16>
    %84 = vector.extract_strided_slice %42 {offsets = [0, 0, 16], sizes = [2, 8, 8], strides = [1, 1, 1]} : vector<2x8x32xbf16> to vector<2x8x8xbf16>
    "tpu.trace_start"() <{level = 10 : i32, message = "bqd,bkd->bqk"}> : () -> ()
    %cst_31 = arith.constant dense<0.000000e+00> : vector<2x8x8xf32>
    %85 = tpu.matmul %83, %84, %cst_31 {dimension_numbers = #tpu.dot_dimension_numbers<[2], [2], [1], [1], [0, 0, 0, 1, 1, 1], [0], [0]>} : vector<2x8x8xbf16>, vector<2x8x8xbf16>, vector<2x8x8xf32> -> vector<2x8x8xf32>
    "tpu.trace_stop"() : () -> ()
    %86 = vector.broadcast %4 : vector<2x1x8xf32> to vector<2x8x8xf32>
    %87 = arith.addf %85, %86 : vector<2x8x8xf32>
    %cst_32 = arith.constant dense<0xFF800000> : vector<2x8xf32>
    %88 = vector.multi_reduction <maximumf>, %87, %cst_32 [2] : vector<2x8x8xf32> to vector<2x8xf32>
    %89 = vector.shape_cast %88 : vector<2x8xf32> to vector<2x8x1xf32>
    %90 = vector.broadcast %89 : vector<2x8x1xf32> to vector<2x8x8xf32>
    %91 = arith.subf %87, %90 : vector<2x8x8xf32>
    %92 = math.exp %91 : vector<2x8x8xf32>
    %cst_33 = arith.constant dense<0.000000e+00> : vector<2x8xf32>
    %93 = vector.multi_reduction <add>, %92, %cst_33 [2] : vector<2x8x8xf32> to vector<2x8xf32>
    %94 = vector.shape_cast %93 : vector<2x8xf32> to vector<2x8x1xf32>
    %95 = tpu.reciprocal %94 {approx = true} : vector<2x8x1xf32> -> vector<2x8x1xf32>
    %96 = vector.broadcast %95 : vector<2x8x1xf32> to vector<2x8x8xf32>
    %97 = arith.mulf %92, %96 : vector<2x8x8xf32>
    %98 = arith.truncf %97 : vector<2x8x8xf32> to vector<2x8x8xbf16>
    %99 = vector.extract_strided_slice %44 {offsets = [0, 0, 16], sizes = [2, 8, 8], strides = [1, 1, 1]} : vector<2x8x32xbf16> to vector<2x8x8xbf16>
    "tpu.trace_start"() <{level = 10 : i32, message = "bqk,bkd->bqd"}> : () -> ()
    %cst_34 = arith.constant dense<0.000000e+00> : vector<2x8x8xf32>
    %100 = tpu.matmul %98, %99, %cst_34 {dimension_numbers = #tpu.dot_dimension_numbers<[2], [1], [1], [2], [0, 0, 0, 1, 1, 2], [0], [0]>} : vector<2x8x8xbf16>, vector<2x8x8xbf16>, vector<2x8x8xf32> -> vector<2x8x8xf32>
    "tpu.trace_stop"() : () -> ()
    %101 = arith.truncf %100 : vector<2x8x8xf32> to vector<2x8x8xbf16>
    %102 = vector.extract_strided_slice %40 {offsets = [0, 0, 24], sizes = [2, 8, 8], strides = [1, 1, 1]} : vector<2x8x32xbf16> to vector<2x8x8xbf16>
    %103 = vector.extract_strided_slice %42 {offsets = [0, 0, 24], sizes = [2, 8, 8], strides = [1, 1, 1]} : vector<2x8x32xbf16> to vector<2x8x8xbf16>
    "tpu.trace_start"() <{level = 10 : i32, message = "bqd,bkd->bqk"}> : () -> ()
    %cst_35 = arith.constant dense<0.000000e+00> : vector<2x8x8xf32>
    %104 = tpu.matmul %102, %103, %cst_35 {dimension_numbers = #tpu.dot_dimension_numbers<[2], [2], [1], [1], [0, 0, 0, 1, 1, 1], [0], [0]>} : vector<2x8x8xbf16>, vector<2x8x8xbf16>, vector<2x8x8xf32> -> vector<2x8x8xf32>
    "tpu.trace_stop"() : () -> ()
    %105 = vector.broadcast %4 : vector<2x1x8xf32> to vector<2x8x8xf32>
    %106 = arith.addf %104, %105 : vector<2x8x8xf32>
    %cst_36 = arith.constant dense<0xFF800000> : vector<2x8xf32>
    %107 = vector.multi_reduction <maximumf>, %106, %cst_36 [2] : vector<2x8x8xf32> to vector<2x8xf32>
    %108 = vector.shape_cast %107 : vector<2x8xf32> to vector<2x8x1xf32>
    %109 = vector.broadcast %108 : vector<2x8x1xf32> to vector<2x8x8xf32>
    %110 = arith.subf %106, %109 : vector<2x8x8xf32>
    %111 = math.exp %110 : vector<2x8x8xf32>
    %cst_37 = arith.constant dense<0.000000e+00> : vector<2x8xf32>
    %112 = vector.multi_reduction <add>, %111, %cst_37 [2] : vector<2x8x8xf32> to vector<2x8xf32>
    %113 = vector.shape_cast %112 : vector<2x8xf32> to vector<2x8x1xf32>
    %114 = tpu.reciprocal %113 {approx = true} : vector<2x8x1xf32> -> vector<2x8x1xf32>
    %115 = vector.broadcast %114 : vector<2x8x1xf32> to vector<2x8x8xf32>
    %116 = arith.mulf %111, %115 : vector<2x8x8xf32>
    %117 = arith.truncf %116 : vector<2x8x8xf32> to vector<2x8x8xbf16>
    %118 = vector.extract_strided_slice %44 {offsets = [0, 0, 24], sizes = [2, 8, 8], strides = [1, 1, 1]} : vector<2x8x32xbf16> to vector<2x8x8xbf16>
    "tpu.trace_start"() <{level = 10 : i32, message = "bqk,bkd->bqd"}> : () -> ()
    %cst_38 = arith.constant dense<0.000000e+00> : vector<2x8x8xf32>
    %119 = tpu.matmul %117, %118, %cst_38 {dimension_numbers = #tpu.dot_dimension_numbers<[2], [1], [1], [2], [0, 0, 0, 1, 1, 2], [0], [0]>} : vector<2x8x8xbf16>, vector<2x8x8xbf16>, vector<2x8x8xf32> -> vector<2x8x8xf32>
    "tpu.trace_stop"() : () -> ()
    %120 = arith.truncf %119 : vector<2x8x8xf32> to vector<2x8x8xbf16>
    %121 = tpu.concatenate %63, %82, %101, %120 in 2 : vector<2x8x8xbf16>, vector<2x8x8xbf16>, vector<2x8x8xbf16>, vector<2x8x8xbf16> -> vector<2x8x32xbf16>
    %122 = vector.shape_cast %121 : vector<2x8x32xbf16> to vector<16x32xbf16>
    %c0_39 = arith.constant 0 : index
    %c0_40 = arith.constant 0 : index
    %c0_41 = arith.constant 0 : index
    %123 = vector.load %arg8[%c0_39, %c0_40, %c0_41] : memref<1x32x32xbf16, #tpu.memory_space<vmem>>, vector<1x32x32xbf16>
    %124 = vector.shape_cast %123 : vector<1x32x32xbf16> to vector<32x32xbf16>
    %cst_42 = arith.constant dense<0.000000e+00> : vector<16x32xf32>
    %125 = tpu.matmul %122, %124, %cst_42 {dimension_numbers = #tpu.dot_dimension_numbers<[1], [0], [0], [1], [0, 0, 1, 1], [], []>} : vector<16x32xbf16>, vector<32x32xbf16>, vector<16x32xf32> -> vector<16x32xf32>
    %c0_43 = arith.constant 0 : index
    %c0_44 = arith.constant 0 : index
    %c0_45 = arith.constant 0 : index
    %126 = vector.load %arg9[%c0_43, %c0_44, %c0_45] : memref<1x1x32xf32, #tpu.memory_space<vmem>>, vector<1x1x32xf32>
    %127 = vector.shape_cast %126 : vector<1x1x32xf32> to vector<1x32xf32>
    %128 = vector.broadcast %127 : vector<1x32xf32> to vector<16x32xf32>
    %129 = arith.addf %125, %128 : vector<16x32xf32>
    %130 = vector.shape_cast %129 : vector<16x32xf32> to vector<2x8x32xf32>
    %131 = arith.addf %3, %130 : vector<2x8x32xf32>
    %c0_46 = arith.constant 0 : index
    %c0_47 = arith.constant 0 : index
    %c0_48 = arith.constant 0 : index
    %132 = vector.load %arg10[%c0_46, %c0_47, %c0_48] : memref<1x1x32xf32, #tpu.memory_space<vmem>>, vector<1x1x32xf32>
    %c0_49 = arith.constant 0 : index
    %c0_50 = arith.constant 0 : index
    %c0_51 = arith.constant 0 : index
    %133 = vector.load %arg11[%c0_49, %c0_50, %c0_51] : memref<1x1x32xf32, #tpu.memory_space<vmem>>, vector<1x1x32xf32>
    %cst_52 = arith.constant dense<0.000000e+00> : vector<2x8xf32>
    %134 = vector.multi_reduction <add>, %131, %cst_52 [2] : vector<2x8x32xf32> to vector<2x8xf32>
    %135 = vector.shape_cast %134 : vector<2x8xf32> to vector<2x8x1xf32>
    %cst_53 = arith.constant 3.200000e+01 : f32
    %136 = vector.broadcast %cst_53 : f32 to vector<2x8x1xf32>
    %137 = arith.divf %135, %136 : vector<2x8x1xf32>
    %138 = vector.broadcast %137 : vector<2x8x1xf32> to vector<2x8x32xf32>
    %139 = arith.subf %131, %138 : vector<2x8x32xf32>
    %140 = arith.mulf %139, %139 : vector<2x8x32xf32>
    %cst_54 = arith.constant dense<0.000000e+00> : vector<2x8xf32>
    %141 = vector.multi_reduction <add>, %140, %cst_54 [2] : vector<2x8x32xf32> to vector<2x8xf32>
    %142 = vector.shape_cast %141 : vector<2x8xf32> to vector<2x8x1xf32>
    %cst_55 = arith.constant 3.200000e+01 : f32
    %143 = vector.broadcast %cst_55 : f32 to vector<2x8x1xf32>
    %144 = arith.divf %142, %143 : vector<2x8x1xf32>
    %145 = vector.broadcast %137 : vector<2x8x1xf32> to vector<2x8x32xf32>
    %146 = arith.subf %131, %145 : vector<2x8x32xf32>
    %cst_56 = arith.constant 9.99999974E-6 : f32
    %147 = vector.broadcast %cst_56 : f32 to vector<2x8x1xf32>
    %148 = arith.addf %144, %147 : vector<2x8x1xf32>
    %149 = math.rsqrt %148 : vector<2x8x1xf32>
    %150 = vector.broadcast %149 : vector<2x8x1xf32> to vector<2x8x32xf32>
    %151 = arith.mulf %146, %150 : vector<2x8x32xf32>
    %152 = vector.broadcast %132 : vector<1x1x32xf32> to vector<2x8x32xf32>
    %153 = arith.mulf %151, %152 : vector<2x8x32xf32>
    %154 = vector.broadcast %133 : vector<1x1x32xf32> to vector<2x8x32xf32>
    %155 = arith.addf %153, %154 : vector<2x8x32xf32>
    %156 = vector.shape_cast %155 : vector<2x8x32xf32> to vector<16x32xf32>
    %157 = arith.truncf %156 : vector<16x32xf32> to vector<16x32xbf16>
    %c0_57 = arith.constant 0 : index
    %c0_58 = arith.constant 0 : index
    %c0_59 = arith.constant 0 : index
    %158 = vector.load %arg12[%c0_57, %c0_58, %c0_59] : memref<1x32x128xbf16, #tpu.memory_space<vmem>>, vector<1x32x128xbf16>
    %159 = vector.shape_cast %158 : vector<1x32x128xbf16> to vector<32x128xbf16>
    %cst_60 = arith.constant dense<0.000000e+00> : vector<16x128xf32>
    %160 = tpu.matmul %157, %159, %cst_60 {dimension_numbers = #tpu.dot_dimension_numbers<[1], [0], [0], [1], [0, 0, 1, 1], [], []>} : vector<16x32xbf16>, vector<32x128xbf16>, vector<16x128xf32> -> vector<16x128xf32>
    %c0_61 = arith.constant 0 : index
    %c0_62 = arith.constant 0 : index
    %c0_63 = arith.constant 0 : index
    %161 = vector.load %arg13[%c0_61, %c0_62, %c0_63] : memref<1x1x128xf32, #tpu.memory_space<vmem>>, vector<1x1x128xf32>
    %162 = vector.shape_cast %161 : vector<1x1x128xf32> to vector<1x128xf32>
    %163 = vector.broadcast %162 : vector<1x128xf32> to vector<16x128xf32>
    %164 = arith.addf %160, %163 : vector<16x128xf32>
    %cst_64 = arith.constant 1.702000e+00 : f32
    %165 = vector.broadcast %cst_64 : f32 to vector<16x128xf32>
    %166 = arith.mulf %165, %164 : vector<16x128xf32>
    %167 = arith.negf %166 : vector<16x128xf32>
    %168 = math.exp %167 : vector<16x128xf32>
    %cst_65 = arith.constant 1.000000e+00 : f32
    %169 = vector.broadcast %cst_65 : f32 to vector<16x128xf32>
    %170 = arith.addf %169, %168 : vector<16x128xf32>
    %171 = arith.divf %169, %170 : vector<16x128xf32>
    %172 = arith.mulf %164, %171 : vector<16x128xf32>
    %173 = arith.truncf %172 : vector<16x128xf32> to vector<16x128xbf16>
    %c0_66 = arith.constant 0 : index
    %c0_67 = arith.constant 0 : index
    %c0_68 = arith.constant 0 : index
    %174 = vector.load %arg14[%c0_66, %c0_67, %c0_68] : memref<1x128x32xbf16, #tpu.memory_space<vmem>>, vector<1x128x32xbf16>
    %175 = vector.shape_cast %174 : vector<1x128x32xbf16> to vector<128x32xbf16>
    %cst_69 = arith.constant dense<0.000000e+00> : vector<16x32xf32>
    %176 = tpu.matmul %173, %175, %cst_69 {dimension_numbers = #tpu.dot_dimension_numbers<[1], [0], [0], [1], [0, 0, 1, 1], [], []>} : vector<16x128xbf16>, vector<128x32xbf16>, vector<16x32xf32> -> vector<16x32xf32>
    %c0_70 = arith.constant 0 : index
    %c0_71 = arith.constant 0 : index
    %c0_72 = arith.constant 0 : index
    %177 = vector.load %arg15[%c0_70, %c0_71, %c0_72] : memref<1x1x32xf32, #tpu.memory_space<vmem>>, vector<1x1x32xf32>
    %178 = vector.shape_cast %177 : vector<1x1x32xf32> to vector<1x32xf32>
    %179 = vector.broadcast %178 : vector<1x32xf32> to vector<16x32xf32>
    %180 = arith.addf %176, %179 : vector<16x32xf32>
    %181 = vector.shape_cast %180 : vector<16x32xf32> to vector<2x8x32xf32>
    %182 = arith.addf %131, %181 : vector<2x8x32xf32>
    %c0_73 = arith.constant 0 : index
    %c0_74 = arith.constant 0 : index
    %c0_75 = arith.constant 0 : index
    %183 = vector.load %arg20[%c0_73, %c0_74, %c0_75] : memref<2x8x32xf32, #tpu.memory_space<vmem>>, vector<2x8x32xf32>
    tpu.vector_store %arg20[%c0_73, %c0_74, %c0_75], %182 {strides = array<i32>} : memref<2x8x32xf32, #tpu.memory_space<vmem>>, vector<2x8x32xf32>,
    %184 = vector.extract_strided_slice %182 {offsets = [0, 0, 0], sizes = [2, 1, 32], strides = [1, 1, 1]} : vector<2x8x32xf32> to vector<2x1x32xf32>
    %c1_i32 = arith.constant 1 : i32
    %185 = arith.cmpi eq, %arg1, %c1_i32 : i32
    %186 = arith.extui %185 : i1 to i32
    %c0_i32_76 = arith.constant 0 : i32
    %187 = arith.cmpi ne, %186, %c0_i32_76 : i32
    scf.if %187 {
      %c0_77 = arith.constant 0 : index
      %c0_78 = arith.constant 0 : index
      %188 = vector.load %arg16[%c0_77, %c0_78] : memref<1x32xf32, #tpu.memory_space<vmem>>, vector<1x32xf32>
      %c0_79 = arith.constant 0 : index
      %c0_80 = arith.constant 0 : index
      %189 = vector.load %arg17[%c0_79, %c0_80] : memref<1x32xf32, #tpu.memory_space<vmem>>, vector<1x32xf32>
      %cst_81 = arith.constant dense<0.000000e+00> : vector<2x1xf32>
      %190 = vector.multi_reduction <add>, %184, %cst_81 [2] : vector<2x1x32xf32> to vector<2x1xf32>
      %191 = vector.shape_cast %190 : vector<2x1xf32> to vector<2x1x1xf32>
      %cst_82 = arith.constant 3.200000e+01 : f32
      %192 = vector.broadcast %cst_82 : f32 to vector<2x1x1xf32>
      %193 = arith.divf %191, %192 : vector<2x1x1xf32>
      %194 = vector.broadcast %193 : vector<2x1x1xf32> to vector<2x1x32xf32>
      %195 = arith.subf %184, %194 : vector<2x1x32xf32>
      %196 = arith.mulf %195, %195 : vector<2x1x32xf32>
      %cst_83 = arith.constant dense<0.000000e+00> : vector<2x1xf32>
      %197 = vector.multi_reduction <add>, %196, %cst_83 [2] : vector<2x1x32xf32> to vector<2x1xf32>
      %198 = vector.shape_cast %197 : vector<2x1xf32> to vector<2x1x1xf32>
      %cst_84 = arith.constant 3.200000e+01 : f32
      %199 = vector.broadcast %cst_84 : f32 to vector<2x1x1xf32>
      %200 = arith.divf %198, %199 : vector<2x1x1xf32>
      %201 = vector.broadcast %193 : vector<2x1x1xf32> to vector<2x1x32xf32>
      %202 = arith.subf %184, %201 : vector<2x1x32xf32>
      %cst_85 = arith.constant 9.99999974E-6 : f32
      %203 = vector.broadcast %cst_85 : f32 to vector<2x1x1xf32>
      %204 = arith.addf %200, %203 : vector<2x1x1xf32>
      %205 = math.rsqrt %204 : vector<2x1x1xf32>
      %206 = vector.broadcast %205 : vector<2x1x1xf32> to vector<2x1x32xf32>
      %207 = arith.mulf %202, %206 : vector<2x1x32xf32>
      %208 = vector.shape_cast %188 : vector<1x32xf32> to vector<1x1x32xf32>
      %209 = vector.broadcast %208 : vector<1x1x32xf32> to vector<2x1x32xf32>
      %210 = arith.mulf %207, %209 : vector<2x1x32xf32>
      %211 = vector.shape_cast %189 : vector<1x32xf32> to vector<1x1x32xf32>
      %212 = vector.broadcast %211 : vector<1x1x32xf32> to vector<2x1x32xf32>
      %213 = arith.addf %210, %212 : vector<2x1x32xf32>
      %214 = vector.shape_cast %213 : vector<2x1x32xf32> to vector<2x32xf32>
      %215 = arith.truncf %214 : vector<2x32xf32> to vector<2x32xbf16>
      %c0_86 = arith.constant 0 : index
      %c0_87 = arith.constant 0 : index
      %216 = vector.load %arg18[%c0_86, %c0_87] : memref<32x32xbf16, #tpu.memory_space<vmem>>, vector<32x32xbf16>
      %cst_88 = arith.constant dense<0.000000e+00> : vector<2x32xf32>
      %217 = tpu.matmul %215, %216, %cst_88 {dimension_numbers = #tpu.dot_dimension_numbers<[1], [0], [0], [1], [0, 0, 1, 1], [], []>} : vector<2x32xbf16>, vector<32x32xbf16>, vector<2x32xf32> -> vector<2x32xf32>
      %c0_89 = arith.constant 0 : index
      %c0_90 = arith.constant 0 : index
      %218 = vector.load %arg19[%c0_89, %c0_90] : memref<1x32xf32, #tpu.memory_space<vmem>>, vector<1x32xf32>
      %219 = vector.broadcast %218 : vector<1x32xf32> to vector<2x32xf32>
      %220 = arith.addf %217, %219 : vector<2x32xf32>
      %cst_91 = arith.constant 1.702000e+00 : f32
      %221 = vector.broadcast %cst_91 : f32 to vector<2x32xf32>
      %222 = arith.mulf %221, %220 : vector<2x32xf32>
      %223 = arith.negf %222 : vector<2x32xf32>
      %224 = math.exp %223 : vector<2x32xf32>
      %cst_92 = arith.constant 1.000000e+00 : f32
      %225 = vector.broadcast %cst_92 : f32 to vector<2x32xf32>
      %226 = arith.addf %225, %224 : vector<2x32xf32>
      %227 = arith.divf %225, %226 : vector<2x32xf32>
      %228 = arith.mulf %220, %227 : vector<2x32xf32>
      %229 = vector.shape_cast %228 : vector<2x32xf32> to vector<2x1x32xf32>
      %c0_93 = arith.constant 0 : index
      %c0_94 = arith.constant 0 : index
      %c0_95 = arith.constant 0 : index
      %230 = vector.load %arg21[%c0_93, %c0_94, %c0_95] : memref<2x1x32xf32, #tpu.memory_space<vmem>>, vector<2x1x32xf32>
      tpu.vector_store %arg21[%c0_93, %c0_94, %c0_95], %229 {strides = array<i32>} : memref<2x1x32xf32, #tpu.memory_space<vmem>>, vector<2x1x32xf32>,
    } else {
    }
    return
  }
  func.func @transform_0(%arg0: i32, %arg1: i32) -> (i32, i32, i32) {
    %c0_i32 = arith.constant 0 : i32
    %c0_i32_0 = arith.constant 0 : i32
    %c0_i32_1 = arith.constant 0 : i32
    return %arg0, %c0_i32, %c0_i32_0 : i32, i32, i32
  }
  func.func @transform_1(%arg0: i32, %arg1: i32) -> (i32, i32, i32) {
    %c0_i32 = arith.constant 0 : i32
    %c0_i32_0 = arith.constant 0 : i32
    %c0_i32_1 = arith.constant 0 : i32
    return %arg0, %c0_i32, %c0_i32_0 : i32, i32, i32
  }
  func.func @transform_2(%arg0: i32, %arg1: i32) -> (i32, i32, i32) {
    %c0_i32 = arith.constant 0 : i32
    %c0_i32_0 = arith.constant 0 : i32
    %c0_i32_1 = arith.constant 0 : i32
    return %arg1, %c0_i32, %c0_i32_0 : i32, i32, i32
  }
  func.func @transform_3(%arg0: i32, %arg1: i32) -> (i32, i32, i32) {
    %c0_i32 = arith.constant 0 : i32
    %c0_i32_0 = arith.constant 0 : i32
    %c0_i32_1 = arith.constant 0 : i32
    return %arg1, %c0_i32, %c0_i32_0 : i32, i32, i32
  }
  func.func @transform_4(%arg0: i32, %arg1: i32) -> (i32, i32, i32) {
    %c0_i32 = arith.constant 0 : i32
    %c0_i32_0 = arith.constant 0 : i32
    %c0_i32_1 = arith.constant 0 : i32
    return %arg1, %c0_i32, %c0_i32_0 : i32, i32, i32
  }
  func.func @transform_5(%arg0: i32, %arg1: i32) -> (i32, i32, i32) {
    %c0_i32 = arith.constant 0 : i32
    %c0_i32_0 = arith.constant 0 : i32
    %c0_i32_1 = arith.constant 0 : i32
    return %arg1, %c0_i32, %c0_i32_0 : i32, i32, i32
  }
  func.func @transform_6(%arg0: i32, %arg1: i32) -> (i32, i32, i32) {
    %c0_i32 = arith.constant 0 : i32
    %c0_i32_0 = arith.constant 0 : i32
    %c0_i32_1 = arith.constant 0 : i32
    return %arg1, %c0_i32, %c0_i32_0 : i32, i32, i32
  }
  func.func @transform_7(%arg0: i32, %arg1: i32) -> (i32, i32, i32) {
    %c0_i32 = arith.constant 0 : i32
    %c0_i32_0 = arith.constant 0 : i32
    %c0_i32_1 = arith.constant 0 : i32
    return %arg1, %c0_i32, %c0_i32_0 : i32, i32, i32
  }
  func.func @transform_8(%arg0: i32, %arg1: i32) -> (i32, i32, i32) {
    %c0_i32 = arith.constant 0 : i32
    %c0_i32_0 = arith.constant 0 : i32
    %c0_i32_1 = arith.constant 0 : i32
    return %arg1, %c0_i32, %c0_i32_0 : i32, i32, i32
  }
  func.func @transform_9(%arg0: i32, %arg1: i32) -> (i32, i32, i32) {
    %c0_i32 = arith.constant 0 : i32
    %c0_i32_0 = arith.constant 0 : i32
    %c0_i32_1 = arith.constant 0 : i32
    return %arg1, %c0_i32, %c0_i32_0 : i32, i32, i32
  }
  func.func @transform_10(%arg0: i32, %arg1: i32) -> (i32, i32, i32) {
    %c0_i32 = arith.constant 0 : i32
    %c0_i32_0 = arith.constant 0 : i32
    %c0_i32_1 = arith.constant 0 : i32
    return %arg1, %c0_i32, %c0_i32_0 : i32, i32, i32
  }
  func.func @transform_11(%arg0: i32, %arg1: i32) -> (i32, i32, i32) {
    %c0_i32 = arith.constant 0 : i32
    %c0_i32_0 = arith.constant 0 : i32
    %c0_i32_1 = arith.constant 0 : i32
    return %arg1, %c0_i32, %c0_i32_0 : i32, i32, i32
  }
  func.func @transform_12(%arg0: i32, %arg1: i32) -> (i32, i32, i32) {
    %c0_i32 = arith.constant 0 : i32
    %c0_i32_0 = arith.constant 0 : i32
    %c0_i32_1 = arith.constant 0 : i32
    return %arg1, %c0_i32, %c0_i32_0 : i32, i32, i32
  }
  func.func @transform_13(%arg0: i32, %arg1: i32) -> (i32, i32, i32) {
    %c0_i32 = arith.constant 0 : i32
    %c0_i32_0 = arith.constant 0 : i32
    %c0_i32_1 = arith.constant 0 : i32
    return %arg1, %c0_i32, %c0_i32_0 : i32, i32, i32
  }
  func.func @transform_14(%arg0: i32, %arg1: i32) -> (i32, i32) {
    %c0_i32 = arith.constant 0 : i32
    %c0_i32_0 = arith.constant 0 : i32
    %c0_i32_1 = arith.constant 0 : i32
    return %c0_i32, %c0_i32_0 : i32, i32
  }
  func.func @transform_15(%arg0: i32, %arg1: i32) -> (i32, i32) {
    %c0_i32 = arith.constant 0 : i32
    %c0_i32_0 = arith.constant 0 : i32
    %c0_i32_1 = arith.constant 0 : i32
    return %c0_i32, %c0_i32_0 : i32, i32
  }
  func.func @transform_16(%arg0: i32, %arg1: i32) -> (i32, i32) {
    %c0_i32 = arith.constant 0 : i32
    %c0_i32_0 = arith.constant 0 : i32
    %c0_i32_1 = arith.constant 0 : i32
    return %c0_i32, %c0_i32_0 : i32, i32
  }
  func.func @transform_17(%arg0: i32, %arg1: i32) -> (i32, i32) {
    %c0_i32 = arith.constant 0 : i32
    %c0_i32_0 = arith.constant 0 : i32
    %c0_i32_1 = arith.constant 0 : i32
    return %c0_i32, %c0_i32_0 : i32, i32
  }
  func.func @transform_18(%arg0: i32, %arg1: i32) -> (i32, i32, i32) {
    %c0_i32 = arith.constant 0 : i32
    %c0_i32_0 = arith.constant 0 : i32
    %c0_i32_1 = arith.constant 0 : i32
    return %arg0, %c0_i32, %c0_i32_0 : i32, i32, i32
  }
  func.func @transform_19(%arg0: i32, %arg1: i32) -> (i32, i32, i32) {
    %c0_i32 = arith.constant 0 : i32
    %c0_i32_0 = arith.constant 0 : i32
    %c0_i32_1 = arith.constant 0 : i32
    return %arg0, %c0_i32, %c0_i32_0 : i32, i32, i32
  }
}

</mosaic_0001>

<bundles_post_ra>
// kernel: tpu_custom_call.1
= control target key start
LH: loop header
LB: loop body
LE: loop exit
PB: predicated region body
PF: predicated region fallthrough
CT: control target
= control target key end

     0   :  { %s3642_s0 = inlined_call_operand.vmem [shape: f32[2,8,32], index: 0, kind: input, shape index: {}]   ;;  %s3643_s1 = inlined_call_operand.vmem [shape: f32[2,1,8], index: 1, kind: input, shape index: {}]   ;;  %s3644_s2 = inlined_call_operand.vmem [shape: f32[2,1,32], index: 2, kind: input, shape index: {}]   ;;  %s3645_s3 = inlined_call_operand.vmem [shape: f32[2,1,32], index: 3, kind: input, shape index: {}]   ;;  %s3646_s4 = inlined_call_operand.vmem [shape: bf16[2,32,96], index: 4, kind: input, shape index: {}]   ;;  %s3647_s5 = inlined_call_operand.vmem [shape: f32[2,1,96], index: 5, kind: input, shape index: {}]   ;;  %s3648_s6 = inlined_call_operand.vmem [shape: bf16[2,32,32], index: 6, kind: input, shape index: {}]   ;;  %s3649_s7 = inlined_call_operand.vmem [shape: f32[2,1,32], index: 7, kind: input, shape index: {}]   ;;  %s3650_s8 = inlined_call_operand.vmem [shape: f32[2,1,32], index: 8, kind: input, shape index: {}]   ;;  %s3651_s9 = inlined_call_operand.vmem [shape: f32[2,1,32], index: 9, kind: input, shape index: {}]   ;;  %s3652_s10 = inlined_call_operand.vmem [shape: bf16[2,32,128], index: 10, kind: input, shape index: {}]   ;;  %s3653_s11 = inlined_call_operand.vmem [shape: f32[2,1,128], index: 11, kind: input, shape index: {}]   ;;  %s3654_s12 = inlined_call_operand.vmem [shape: bf16[2,128,32], index: 12, kind: input, shape index: {}]   ;;  %s3655_s13 = inlined_call_operand.vmem [shape: f32[2,1,32], index: 13, kind: input, shape index: {}]   ;;  %s3656_s14 = inlined_call_operand.vmem [shape: f32[1,32], index: 14, kind: input, shape index: {}]   ;;  %s3657_s15 = inlined_call_operand.vmem [shape: f32[1,32], index: 15, kind: input, shape index: {}]   ;;  %s3658_s16 = inlined_call_operand.vmem [shape: bf16[32,32], index: 16, kind: input, shape index: {}]   ;;  %s3659_s17 = inlined_call_operand.vmem [shape: f32[1,32], index: 17, kind: input, shape index: {}]   ;;  %s3660_s18 = inlined_call_operand.hbm [shape: f32[2,8,32], index: 18, kind: output, shape index: {0}]   ;;  %s3661_s19 = inlined_call_operand.hbm [shape: f32[2,1,32], index: 19, kind: output, shape index: {1}]  }
   0x1   :  { %3668 = sst [smem:[#allocation11_spill]] %s3642_s0 }
   0x2   :  { %3669 = sst [smem:[#allocation12_spill]] %s3643_s1 }
   0x3   :  { %3670 = sst [smem:[#allocation13_spill]] %s3644_s2 }
   0x4   :  { %3671 = sst [smem:[#allocation14_spill]] %s3645_s3 }
   0x5   :  { %3672 = sst [smem:[#allocation15_spill]] %s3646_s4 }
   0x6   :  { %3673 = sst [smem:[#allocation16_spill]] %s3648_s6 }
   0x7   :  { %3674 = sst [smem:[#allocation17_spill]] %s3657_s15 }
   0x8   :  { %3675 = sst [smem:[#allocation18_spill]] %s3659_s17 }
   0x9   :  { %3676 = sst [smem:[#allocation19_spill]] %s3660_s18 }
   0xa   :  { %3677 = sst [smem:[#allocation20_spill]] %s3661_s19 }
   0xb   :  { %25 = vsyncpa [#allocation3], 0 }
   0xc   :  { %26 = vsyncpa [#allocation5], 0  ;;  %s3198_s0 = smov 0   ;;  %s3200_s30 = smov 0  }
   0xd   :  { %s3202_s20 = smov 0  }
   0xe LB: > { %3678 = sst [smem:[#allocation8_spill]] %s3069_s30  ;;  %s41_s1 = sadd.s32 1, %s3069_s30  ;;  %s3073_s20 = sphi %s3202_s20, %s32_s20   ;;  %s3069_s30 = sphi %s3200_s30, %s3702_s30   ;;  %s3065_s0 = sphi %s3198_s0, %s3701_s0  }
   0xf   : > { %3679 = sst [smem:[#allocation9_spill]] %s3073_s20  ;;  %p42_p0 = scmp.ge.s32.totalorder %s41_s1, 2 }
  0x10   : > { %p2587_p1 = scmp.ge.s32.totalorder %s3073_s20, 1  ;;  %p669_p2 = scmp.lt.s32.totalorder %s3073_s20, 3 }
  0x11   : > { %s3704_s1 = smov (%p42_p0, %s41_s1), 0 }
  0x12   : > { %3680 = sst [smem:[#allocation10_spill]] %s3704_s1  ;;  %p670_p3 = pnand %p2587_p1, %p669_p2 }
  0x13   : > { %p779_p4 = scmp.lt.s32.totalorder (!%p670_p3), %s3065_s0, 1  ;;  %s3683_s4 = sld [smem:[#allocation15_spill]] (!%p670_p3) }
  0x14   : > { %673 = sbr.rel (%p670_p3) target bundleno = 4830 (0x12de), region = 92  ;;  %s3684_s6 = sld [smem:[#allocation16_spill]] (!%p670_p3) }
  0x15   : > { %p2596_p5 = scmp.ne.s32.totalorder (!%p670_p3), %s3065_s0, 0 }
  0x1b   : > { %s3221_s22 = scalar_select %p779_p4, %s3065_s0, 1 }
  0x1c   : > { %829 = sbr.rel (%p2596_p5) target bundleno = 36 (0x24), region = 96  ;;  %s3685_s2 = sld [smem:[#allocation11_spill]] (!%p2596_p5)  ;;  %vm832_vm0 = vcmask (!%p2596_p5), 261120  }
  0x1d   : > { %s2655_s29 = sshll.u32 %s3221_s22, 4  ;;  %s803_s28 = scalar_lea.vmem %s3650_s8, %s3221_s22 }
  0x1e   : > { %s3239_s19 = scalar_lea.vmem %s3683_s4, %s2655_s29  ;;  %s3244_s17 = scalar_lea.vmem %s3684_s6, %s2655_s29 }
  0x1f   : > { %s806_s30 = scalar_lea.vmem %s3651_s9, %s3221_s22  ;;  %s3261_s4 = scalar_lea.vmem %s3652_s10, %s2655_s29 }
  0x20   : > { %s814_s6 = scalar_lea.vmem %s3653_s11, %s3221_s22  ;;  %s2658_s15 = sshll.u32 %s3221_s22, 6 }
  0x21   : > { %s3271_s3 = scalar_lea.vmem %s3654_s12, %s2658_s15  ;;  %s822_s21 = scalar_lea.vmem %s3655_s13, %s3221_s22 }
  0x22   : > { %v830_v0 = vld [vmem:[%s3685_s2] sm:$0xff] (!%p2596_p5)  ;;  %v831_v1 = vld [vmem:[%s3685_s2 + $0x8] sm:$0xff] (!%p2596_p5) }
  0x23   : > { %833 = vst.msk [vmem:[#allocation2] sm:$0xff] %vm832_vm0, %v830_v0  ;;  %834 = vst.msk [vmem:[#allocation2 + $0x8] sm:$0xff] %vm832_vm0, %v831_v1 }
  0x24 PF: > { %vm841_vm1 = vcmask 261120   ;;  %v2919_v16 = vld [vmem:[%s3239_s19] sm:$0xff]   ;;  %v3075_v17 = vmov 0.0   ;;  %v2920_v18 = vld [vmem:[%s3239_s19 + $0x8] sm:$0xff]   ;;  %vm3076_vm2 = vmmov 0   ;;  %s3686_s20 = sld [smem:[#allocation13_spill]]  ;;  %s3690_s18 = scalar_lea.vmem %s3647_s5, %s3221_s22 }
  0x25   : > { %2712 = vmatprep.subr.bf16.mxu0 %v3075_v17  ;;  %2732 = vmatprep.subr.bf16.mxu1 %v3075_v17  ;;  %s3688_s27 = sld [smem:[#allocation14_spill]]  ;;  %v2599_v36 = vld [vmem:[%s3690_s18] ss:$0 sm:$0xff]  ;;  %s3077_s15 = smov 96   ;;  %vm970_vm3 = vcmask 64512   ;;  %vm1095_vm4 = vcmask 1043456  }
  0x26   : > { %2713 = vmatpush3.bf16.msra.mxu0 %v2919_v16  ;;  %2716 = vmatprep.mubr.msk.bf16.mxu0 %vm3076_vm2, %v3075_v17  ;;  %s3080_s29 = smov 120   ;;  %s3081_s23 = smov 56   ;;  %vm1879_vm5 = vcmask 130048   ;;  %vm1884_vm6 = vcmask 195584  }
  0x27   : > { %2714 = vmatprep.subr.bf16.mxu0 %v3075_v17  ;;  %2734 = vmatprep.mubr.msk.bf16.mxu1 %vm3076_vm2, %v3075_v17  ;;  %s3082_s18 = smov 80   ;;  %s3084_s19 = smov 48  }
  0x28   : > { %s3086_s24 = smov 104   ;;  %s3087_s26 = smov 40  }
  0x29   : > { %p2643_p6 = scmp.ne.s32.totalorder %s3065_s0, 1 }
  0x2a   : > { %v3284_v2 = vld [vmem:[#allocation2] sm:$0xff]  ;;  %v3286_v3 = vld [vmem:[#allocation2 + $0x8] sm:$0xff]  ;;  %2715 = vmatpush3.bf16.msra.mxu0 %v2920_v18  ;;  %s3687_s25 = scalar_lea.vmem %s3686_s20, %s3221_s22  ;;  %s3085_s20 = smov 72   ;;  %vm2214_vm7 = vcmask (!%p2643_p6), 253952   ;;  %vm3092_vm8 = vmmov (!%p2643_p6), 0   ;;  %vm2263_vm9 = vcmask (!%p2643_p6), 1041409  }
  0x2b   : > { %v842_v4 = vsel %vm841_vm1, %v3284_v2, 0.0  ;;  %v845_v5 = vsel %vm841_vm1, %v3286_v3, 0.0  ;;  %2720 = vmatprep.subr.bf16.mxu0 %v3075_v17  ;;  %v2597_v27 = vld [vmem:[%s3687_s25] ss:$0 sm:$0xff]  ;;  %s3689_s1 = scalar_lea.vmem %s3688_s27, %s3221_s22  ;;  %s3691_s25 = sld [smem:[#allocation12_spill]] }
  0x2c   : > { %843 = vadd.xlane.f32.xlu0 %v842_v4  ;;  %v2598_v31 = vld [vmem:[%s3689_s1] ss:$0 sm:$0xff]  ;;  %s3078_s27 = smov 64   ;;  %s3079_s1 = smov 88  }
  0x30   : > { %846 = vadd.xlane.f32.xlu0 %v845_v5 }
  0x31   : > { %v3345_v49 = vld [vmem:[%s3691_s25] ss:$0 sm:$0xff]  ;;  %v3352_v56 = vld [vmem:[%s3691_s25 + $0x1] ss:$0 sm:$0xff] }
  0xb9   : > { %v844_v6 = vpop.xlane.xlu0 %843 }
  0xba   : > { %v849_v7 = vmul.f32 0.03125, %v844_v6 }
  0xbc   : > { %v851_v8 = vsub.f32 %v3284_v2, %v849_v7 }
  0xbd   : > { %v847_v9 = vpop.xlane.xlu0 %846 }
  0xbe   : > { %v850_v10 = vmul.f32 0.03125, %v847_v9  ;;  %v853_v11 = vmul.f32 %v851_v8, %v851_v8 }
  0xc0   : > { %v852_v12 = vsub.f32 %v3286_v3, %v850_v10  ;;  %v855_v13 = vsel %vm841_vm1, %v853_v11, 0.0 }
  0xc1   : > { %856 = vadd.xlane.f32.xlu1 %v855_v13 }
  0xc2   : > { %v854_v14 = vmul.f32 %v852_v12, %v852_v12 }
  0xc4   : > { %v858_v15 = vsel %vm841_vm1, %v854_v14, 0.0 }
  0xc5   : > { %859 = vadd.xlane.f32.xlu1 %v858_v15 }
 0x14e   : > { %v857_v19 = vpop.xlane.xlu1 %856 }
 0x14f   : > { %v861_v20 = vmul.f32 0.03125, %v857_v19 }
 0x151   : > { %v863_v21 = vadd.f32 1e-05, %v861_v20 }
 0x152   : > { %v860_v22 = vpop.xlane.xlu1 %859 }
 0x153   : > { %2933 = vrsqrt.f32 %v863_v21  ;;  %v862_v23 = vmul.f32 0.03125, %v860_v22 }
 0x155   : > { %v864_v24 = vadd.f32 1e-05, %v862_v23 }
 0x157   : > { %2935 = vrsqrt.f32 %v864_v24 }
 0x15d   : > { %v2934_v25 = vpop.eup %2933 }
 0x15e   : > { %v867_v26 = vmul.f32 %v2934_v25, %v851_v8 }
 0x160   : > { %v875_v30 = vmul.f32 %v2597_v27, %v867_v26 }
 0x161   : > { %v2936_v28 = vpop.eup %2935 }
 0x162   : > { %v868_v29 = vmul.f32 %v2936_v28, %v852_v12  ;;  %v883_v33 = vadd.f32 %v2598_v31, %v875_v30 }
 0x164   : > { %v876_v32 = vmul.f32 %v2597_v27, %v868_v29 }
 0x166   : > { %v884_v34 = vadd.f32 %v2598_v31, %v876_v32 }
 0x168   : > { %v885_v35 = vpack.c.bf16 %v884_v34, %v883_v33 }
 0x16a   : > { %2717 = vmatmul.mubr.msk.bf16.vlgmr.msra.gmra.mrb[0].mxu0 %vm841_vm1, %v885_v35 }
 0x16b   : > { %2722 = vmatprep.mubr.msk.bf16.mxu0 %vm3076_vm2, %v3075_v17 }
 0x23d   : > { %v946_v37 = vpop.f32.mrb[0].mxu0 }
 0x23e   : > { %v947_v38 = vadd.f32 %v2599_v36, %v946_v37  ;;  %v2718_v39 = vpop.f32.mrb[1].mxu0 }
 0x23f   : > { %v949_v40 = vpop.f32.mrb[2].mxu0 }
 0x240   : > { %v3324_v41 = vpack.c.bf16 %v947_v38, %v947_v38  ;;  %v950_v42 = vadd.f32 %v2599_v36, %v949_v40  ;;  %v2719_v43 = vpop.f32.mrb[3].mxu0 }
 0x242   : > { %v3326_v44 = vpack.c.bf16 %v950_v42, %v950_v42  ;;  %968 = vrot.lane.b32.xlu0 %v3324_v41, %s3077_s15 }
 0x244   : > { %1018 = vrot.lane.b32.xlu1 %v3326_v44, %s3077_s15  ;;  %s3083_s15 = smov 112  }
 0x2b4   : > { %v969_v45 = vpop.permute.xlu0 %968 }
 0x2b5   : > { %v975_v46 = vsel %vm970_vm3, %v969_v45, 0 }
 0x2b6   : > { %2721 = vmatpush3.bf16.xpose.msra.mxu0 %v975_v46  ;;  %v1019_v47 = vpop.permute.xlu1 %1018 }
 0x2b7   : > { %2726 = vmatprep.subr.bf16.mxu0 %v3075_v17  ;;  %v1024_v48 = vsel %vm970_vm3, %v1019_v47, 0 }
 0x2bd   : > { %2723 = vmatmul.mubr.msk.bf16.vlgmr.msra.gmra.mrb[4].mxu0 %vm970_vm3, %v3324_v41 }
 0x2be   : > { %2727 = vmatpush3.bf16.xpose.msra.mxu0 %v1024_v48  ;;  %2728 = vmatprep.mubr.msk.bf16.mxu0 %vm3076_vm2, %v3075_v17 }
 0x2bf   : > { %2738 = vmatprep.subr.bf16.mxu0 %v3075_v17 }
 0x2c5   : > { %2729 = vmatmul.mubr.msk.bf16.vlgmr.msra.gmra.mrb[8].mxu0 %vm970_vm3, %v3326_v44 }
 0x2c6   : > { %2740 = vmatprep.mubr.msk.bf16.mxu0 %vm3076_vm2, %v3075_v17 }
 0x390   : > { %v1011_v50 = vpop.f32.mrb[4].mxu0 }
 0x391   : > { %v1012_v51 = vadd.f32 %v3345_v49, %v1011_v50  ;;  %v2724_v52 = vpop.f32.mrb[5].mxu0 }
 0x392   : > { %v1014_v53 = vpop.f32.mrb[6].mxu0 }
 0x393   : > { %v2725_v54 = vpop.f32.mrb[7].mxu0  ;;  %v1066_v55 = vsel %vm970_vm3, %v1012_v51, -inf }
 0x394   : > { %1067 = vmax.xlane.f32.xlu1 %v1066_v55 }
 0x398   : > { %v1060_v57 = vpop.f32.mrb[8].mxu0 }
 0x399   : > { %v1061_v58 = vadd.f32 %v3352_v56, %v1060_v57  ;;  %v2730_v59 = vpop.f32.mrb[9].mxu0 }
 0x39a   : > { %v1063_v60 = vpop.f32.mrb[10].mxu0 }
 0x39b   : > { %v2731_v61 = vpop.f32.mrb[11].mxu0  ;;  %v1069_v62 = vsel %vm970_vm3, %v1061_v58, -inf }
 0x39c   : > { %1070 = vmax.xlane.f32.xlu0 %v1069_v62 }
 0x3a5   : > { %1139 = vrot.lane.b32.xlu1 %v3326_v44, %s3078_s27 }
 0x3a9   : > { %1191 = vrot.lane.b32.xlu1 %v3324_v41, %s3079_s1 }
 0x421   : > { %v1068_v63 = vpop.xlane.xlu1 %1067 }
 0x422   : > { %v1072_v0 = vsub.f32 %v1012_v51, %v1068_v63 }
 0x424   : > { %v1074_v1 = vmul.f32 1.442695, %v1072_v0 }
 0x425   : > { %v1140_v4 = vpop.permute.xlu1 %1139 }
 0x426   : > { %2937 = vpow2.f32 %v1074_v1  ;;  %v1145_v5 = vsel %vm1095_vm4, %v1140_v4, 0 }
 0x427   : > { %2739 = vmatpush3.bf16.msra.mxu0 %v1145_v5 }
 0x428   : > { %2750 = vmatprep.subr.bf16.mxu0 %v3075_v17 }
 0x429   : > { %v1071_v6 = vpop.xlane.xlu0 %1070  ;;  %v1192_v14 = vpop.permute.xlu1 %1191 }
 0x42a   : > { %v1073_v7 = vsub.f32 %v1061_v58, %v1071_v6  ;;  %v1197_v22 = vsel %vm970_vm3, %v1192_v14, 0 }
 0x42c   : > { %v1076_v8 = vmul.f32 1.442695, %v1073_v7 }
 0x42e   : > { %2939 = vpow2.f32 %v1076_v8 }
 0x430   : > { %v2938_v9 = vpop.eup %2937 }
 0x431   : > { %v1078_v10 = vsel %vm970_vm3, %v2938_v9, 0.0 }
 0x432   : > { %1079 = vadd.xlane.f32.xlu0 %v1078_v10 }
 0x438   : > { %v2940_v11 = vpop.eup %2939 }
 0x439   : > { %v1081_v12 = vsel %vm970_vm3, %v2940_v11, 0.0 }
 0x43a   : > { %1082 = vadd.xlane.f32.xlu1 %v1081_v12 }
 0x448   : > { %1090 = vrot.lane.b32.xlu0 %v3324_v41, %s3078_s27  ;;  %s3088_s27 = smov 8  }
 0x44b   : > { %1241 = vrot.lane.b32.xlu1 %v3326_v44, %s3079_s1  ;;  %s3089_s1 = smov 16  }
 0x44c   : > { %1189 = vrot.lane.b32.xlu0 %v3324_v41, %s3080_s29 }
 0x44f   : > { %1239 = vrot.lane.b32.xlu1 %v3326_v44, %s3080_s29  ;;  %s3090_s29 = smov 24  }
 0x4bf   : > { %v1080_v13 = vpop.xlane.xlu0 %1079 }
 0x4c0   : > { %2941 = vrcp.f32 %v1080_v13 }
 0x4c3   : > { %v1091_v15 = vpop.permute.xlu0 %1090 }
 0x4c4   : > { %v1097_v16 = vsel %vm1095_vm4, %v1091_v15, 0 }
 0x4c5   : > { %2733 = vmatpush3.bf16.msra.mxu1 %v1097_v16 }
 0x4c6   : > { %2744 = vmatprep.subr.bf16.mxu1 %v3075_v17 }
 0x4c7   : > { %v1083_v18 = vpop.xlane.xlu1 %1082  ;;  %v1190_v27 = vpop.permute.xlu0 %1189 }
 0x4c8   : > { %2943 = vrcp.f32 %v1083_v18 }
 0x4ca   : > { %v2942_v19 = vpop.eup %2941 }
 0x4cb   : > { %v1086_v20 = vmul.f32 %v2942_v19, %v2938_v9  ;;  %v1242_v25 = vpop.permute.xlu1 %1241 }
 0x4cc   : > { %v1247_v28 = vsel %vm970_vm3, %v1242_v25, 0 }
 0x4cd   : > { %v1088_v21 = vpack.c.bf16 %v1086_v20, %v1086_v20 }
 0x4cf   : > { %2735 = vmatmul.mubr.msk.bf16.vlgmr.msra.gmra.mrb[0].mxu1 %vm970_vm3, %v1088_v21  ;;  %v1240_v29 = vpop.permute.xlu1 %1239 }
 0x4d0   : > { %2745 = vmatpush3.bf16.xpose.msra.mxu1 %v1197_v22  ;;  %2746 = vmatprep.mubr.msk.bf16.mxu1 %vm3076_vm2, %v3075_v17 }
 0x4d1   : > { %2756 = vmatprep.subr.bf16.mxu1 %v3075_v17 }
 0x4d2   : > { %v2944_v23 = vpop.eup %2943 }
 0x4d3   : > { %v1087_v24 = vmul.f32 %v2944_v23, %v2940_v11 }
 0x4d5   : > { %v1089_v26 = vpack.c.bf16 %v1087_v24, %v1087_v24 }
 0x4d7   : > { %2741 = vmatmul.mubr.msk.bf16.vlgmr.msra.gmra.mrb[12].mxu0 %vm970_vm3, %v1089_v26  ;;  %2747 = vmatmul.mubr.msk.bf16.vlgmr.msra.gmra.mrb[4].mxu1 %vm970_vm3, %v1190_v27 }
 0x4d8   : > { %2751 = vmatpush3.bf16.xpose.msra.mxu0 %v1247_v28  ;;  %2752 = vmatprep.mubr.msk.bf16.mxu0 %vm3076_vm2, %v3075_v17 }
 0x4d9   : > { %2762 = vmatprep.subr.bf16.mxu0 %v3075_v17  ;;  %2758 = vmatprep.mubr.msk.bf16.mxu1 %vm3076_vm2, %v3075_v17 }
 0x4df   : > { %2753 = vmatmul.mubr.msk.bf16.vlgmr.msra.gmra.mrb[16].mxu0 %vm970_vm3, %v1240_v29 }
 0x4e0   : > { %2764 = vmatprep.mubr.msk.bf16.mxu0 %vm3076_vm2, %v3075_v17 }
 0x5a2   : > { %v3384_v30 = vpop.f32.mrb[0].mxu1 }
 0x5a3   : > { %v2736_v31 = vpop.f32.mrb[1].mxu1 }
 0x5a4   : > { %v1136_v32 = vpop.f32.mrb[2].mxu1 }
 0x5a5   : > { %v2737_v33 = vpop.f32.mrb[3].mxu1 }
 0x5aa   : > { %v3386_v34 = vpop.f32.mrb[12].mxu0  ;;  %v1233_v35 = vpop.f32.mrb[4].mxu1 }
 0x5ab   : > { %v1234_v36 = vadd.f32 %v3345_v49, %v1233_v35  ;;  %v2742_v37 = vpop.f32.mrb[13].mxu0  ;;  %v2748_v38 = vpop.f32.mrb[5].mxu1 }
 0x5ac   : > { %v1184_v39 = vpop.f32.mrb[14].mxu0  ;;  %v1236_v40 = vpop.f32.mrb[6].mxu1 }
 0x5ad   : > { %v2743_v42 = vpop.f32.mrb[15].mxu0  ;;  %v2749_v43 = vpop.f32.mrb[7].mxu1  ;;  %v1289_v45 = vsel %vm970_vm3, %v1234_v36, -inf }
 0x5ae   : > { %1290 = vmax.xlane.f32.xlu0 %v1289_v45 }
 0x5b2   : > { %v1283_v46 = vpop.f32.mrb[16].mxu0 }
 0x5b3   : > { %v1284_v47 = vadd.f32 %v3352_v56, %v1283_v46  ;;  %v2754_v48 = vpop.f32.mrb[17].mxu0 }
 0x5b4   : > { %v1286_v50 = vpop.f32.mrb[18].mxu0 }
 0x5b5   : > { %v2755_v51 = vpop.f32.mrb[19].mxu0  ;;  %v1292_v52 = vsel %vm970_vm3, %v1284_v47, -inf }
 0x5b6   : > { %1293 = vmax.xlane.f32.xlu1 %v1292_v52 }
 0x5c7   : > { %1361 = vrot.lane.b32.xlu1 %v3326_v44, %s3081_s23 }
 0x5cb   : > { %1413 = vrot.lane.b32.xlu1 %v3324_v41, %s3082_s18 }
 0x5cf   : > { %1463 = vrot.lane.b32.xlu1 %v3326_v44, %s3082_s18  ;;  %s3692_s18 = scalar_lea.vmem %s3649_s7, %s3221_s22 }
 0x5d3   : > { %1461 = vrot.lane.b32.xlu1 %v3326_v44, %s3083_s15 }
 0x63b   : > { %v1291_v53 = vpop.xlane.xlu0 %1290 }
 0x63c   : > { %v1295_v54 = vsub.f32 %v1234_v36, %v1291_v53 }
 0x63e   : > { %v1297_v55 = vmul.f32 1.442695, %v1295_v54 }
 0x640   : > { %2945 = vpow2.f32 %v1297_v55 }
 0x643   : > { %v1294_v57 = vpop.xlane.xlu1 %1293 }
 0x644   : > { %v1296_v58 = vsub.f32 %v1284_v47, %v1294_v57 }
 0x646   : > { %v1299_v59 = vmul.f32 1.442695, %v1296_v58 }
 0x647   : > { %v1362_v60 = vpop.permute.xlu1 %1361 }
 0x648   : > { %2947 = vpow2.f32 %v1299_v59  ;;  %v1367_v61 = vsel %vm1095_vm4, %v1362_v60, 0 }
 0x649   : > { %2763 = vmatpush3.bf16.msra.mxu0 %v1367_v61 }
 0x64a   : > { %v2946_v62 = vpop.eup %2945  ;;  %2774 = vmatprep.subr.bf16.mxu0 %v3075_v17 }
 0x64b   : > { %v1301_v63 = vsel %vm970_vm3, %v2946_v62, 0.0  ;;  %v1414_v11 = vpop.permute.xlu1 %1413 }
 0x64c   : > { %1302 = vadd.xlane.f32.xlu0 %v1301_v63  ;;  %v1419_v15 = vsel %vm970_vm3, %v1414_v11, 0 }
 0x64f   : > { %v1464_v14 = vpop.permute.xlu1 %1463 }
 0x650   : > { %v1469_v18 = vsel %vm970_vm3, %v1464_v14, 0 }
 0x652   : > { %v2948_v0 = vpop.eup %2947 }
 0x653   : > { %v1304_v1 = vsel %vm970_vm3, %v2948_v0, 0.0  ;;  %v1462_v20 = vpop.permute.xlu1 %1461 }
 0x654   : > { %1305 = vadd.xlane.f32.xlu0 %v1304_v1 }
 0x66a   : > { %1313 = vrot.lane.b32.xlu0 %v3324_v41, %s3081_s23 }
 0x66e   : > { %1411 = vrot.lane.b32.xlu0 %v3324_v41, %s3083_s15 }
 0x6d9   : > { %v1303_v4 = vpop.xlane.xlu0 %1302 }
 0x6da   : > { %2949 = vrcp.f32 %v1303_v4 }
 0x6e1   : > { %v1306_v5 = vpop.xlane.xlu0 %1305 }
 0x6e2   : > { %2951 = vrcp.f32 %v1306_v5 }
 0x6e4   : > { %v2950_v6 = vpop.eup %2949 }
 0x6e5   : > { %v1309_v7 = vmul.f32 %v2950_v6, %v2946_v62  ;;  %v1314_v8 = vpop.permute.xlu0 %1313 }
 0x6e6   : > { %v1319_v9 = vsel %vm1095_vm4, %v1314_v8, 0 }
 0x6e7   : > { %2757 = vmatpush3.bf16.msra.mxu1 %v1319_v9  ;;  %v1311_v10 = vpack.c.bf16 %v1309_v7, %v1309_v7 }
 0x6e8   : > { %2768 = vmatprep.subr.bf16.mxu1 %v3075_v17 }
 0x6e9   : > { %v1412_v19 = vpop.permute.xlu0 %1411 }
 0x6ea   : > { %2759 = vmatmul.mubr.msk.bf16.vlgmr.msra.gmra.mrb[8].mxu1 %vm970_vm3, %v1311_v10 }
 0x6eb   : > { %2770 = vmatprep.mubr.msk.bf16.mxu1 %vm3076_vm2, %v3075_v17 }
 0x6ec   : > { %v2952_v12 = vpop.eup %2951 }
 0x6ed   : > { %v1310_v13 = vmul.f32 %v2952_v12, %v2948_v0 }
 0x6ef   : > { %v1312_v16 = vpack.c.bf16 %v1310_v13, %v1310_v13 }
 0x6f0   : > { %2769 = vmatpush3.bf16.xpose.msra.mxu1 %v1419_v15 }
 0x6f1   : > { %2765 = vmatmul.mubr.msk.bf16.vlgmr.msra.gmra.mrb[20].mxu0 %vm970_vm3, %v1312_v16  ;;  %2780 = vmatprep.subr.bf16.mxu1 %v3075_v17 }
 0x6f2   : > { %2775 = vmatpush3.bf16.xpose.msra.mxu0 %v1469_v18  ;;  %2776 = vmatprep.mubr.msk.bf16.mxu0 %vm3076_vm2, %v3075_v17 }
 0x6f3   : > { %2786 = vmatprep.subr.bf16.mxu0 %v3075_v17 }
 0x6f7   : > { %2771 = vmatmul.mubr.msk.bf16.vlgmr.msra.gmra.mrb[12].mxu1 %vm970_vm3, %v1412_v19 }
 0x6f8   : > { %2782 = vmatprep.mubr.msk.bf16.mxu1 %vm3076_vm2, %v3075_v17 }
 0x6f9   : > { %2777 = vmatmul.mubr.msk.bf16.vlgmr.msra.gmra.mrb[24].mxu0 %vm970_vm3, %v1462_v20 }
 0x6fa   : > { %2788 = vmatprep.mubr.msk.bf16.mxu0 %vm3076_vm2, %v3075_v17 }
 0x7bd   : > { %v3420_v21 = vpop.f32.mrb[8].mxu1 }
 0x7be   : > { %v2760_v22 = vpop.f32.mrb[9].mxu1 }
 0x7bf   : > { %v1358_v23 = vpop.f32.mrb[10].mxu1 }
 0x7c0   : > { %v2761_v24 = vpop.f32.mrb[11].mxu1 }
 0x7c4   : > { %v3422_v25 = vpop.f32.mrb[20].mxu0 }
 0x7c5   : > { %v2766_v26 = vpop.f32.mrb[21].mxu0 }
 0x7c6   : > { %v1406_v27 = vpop.f32.mrb[22].mxu0 }
 0x7c7   : > { %v2767_v28 = vpop.f32.mrb[23].mxu0 }
 0x7ca   : > { %v1455_v29 = vpop.f32.mrb[12].mxu1 }
 0x7cb   : > { %v1456_v31 = vadd.f32 %v3345_v49, %v1455_v29  ;;  %v2772_v32 = vpop.f32.mrb[13].mxu1 }
 0x7cc   : > { %v1458_v33 = vpop.f32.mrb[14].mxu1  ;;  %v1505_v35 = vpop.f32.mrb[24].mxu0 }
 0x7cd   : > { %v1506_v36 = vadd.f32 %v3352_v56, %v1505_v35  ;;  %v2773_v37 = vpop.f32.mrb[15].mxu1  ;;  %v2778_v38 = vpop.f32.mrb[25].mxu0  ;;  %v1511_v39 = vsel %vm970_vm3, %v1456_v31, -inf }
 0x7ce   : > { %1512 = vmax.xlane.f32.xlu0 %v1511_v39  ;;  %v1508_v40 = vpop.f32.mrb[26].mxu0 }
 0x7cf   : > { %v2779_v42 = vpop.f32.mrb[27].mxu0  ;;  %v1514_v43 = vsel %vm970_vm3, %v1506_v36, -inf }
 0x7d0   : > { %1515 = vmax.xlane.f32.xlu1 %v1514_v43 }
 0x7e1   : > { %1583 = vrot.lane.b32.xlu1 %v3326_v44, %s3084_s19 }
 0x7e5   : > { %1635 = vrot.lane.b32.xlu1 %v3324_v41, %s3085_s20 }
 0x7e9   : > { %1685 = vrot.lane.b32.xlu1 %v3326_v44, %s3085_s20 }
 0x7ed   : > { %1683 = vrot.lane.b32.xlu1 %v3326_v44, %s3086_s24 }
 0x85b   : > { %v1513_v45 = vpop.xlane.xlu0 %1512 }
 0x85c   : > { %v1517_v46 = vsub.f32 %v1456_v31, %v1513_v45 }
 0x85d   : > { %v1516_v47 = vpop.xlane.xlu1 %1515 }
 0x85e   : > { %v1519_v48 = vmul.f32 1.442695, %v1517_v46  ;;  %v1518_v50 = vsub.f32 %v1506_v36, %v1516_v47 }
 0x860   : > { %2953 = vpow2.f32 %v1519_v48  ;;  %v1521_v51 = vmul.f32 1.442695, %v1518_v50 }
 0x861   : > { %v1584_v52 = vpop.permute.xlu1 %1583 }
 0x862   : > { %2955 = vpow2.f32 %v1521_v51  ;;  %v1589_v53 = vsel %vm1095_vm4, %v1584_v52, 0 }
 0x863   : > { %2787 = vmatpush3.bf16.msra.mxu0 %v1589_v53 }
 0x864   : > { %2798 = vmatprep.subr.bf16.mxu0 %v3075_v17 }
 0x865   : > { %v1636_v0 = vpop.permute.xlu1 %1635 }
 0x866   : > { %v1641_v8 = vsel %vm970_vm3, %v1636_v0, 0 }
 0x869   : > { %v1686_v7 = vpop.permute.xlu1 %1685 }
 0x86a   : > { %v2954_v54 = vpop.eup %2953  ;;  %v1691_v10 = vsel %vm970_vm3, %v1686_v7, 0 }
 0x86b   : > { %v1523_v55 = vsel %vm970_vm3, %v2954_v54, 0.0 }
 0x86c   : > { %v2956_v57 = vpop.eup %2955  ;;  %1524 = vadd.xlane.f32.xlu0 %v1523_v55 }
 0x86d   : > { %v1526_v58 = vsel %vm970_vm3, %v2956_v57, 0.0  ;;  %v1684_v12 = vpop.permute.xlu1 %1683 }
 0x870   : > { %1527 = vadd.xlane.f32.xlu0 %v1526_v58 }
 0x886   : > { %1535 = vrot.lane.b32.xlu0 %v3324_v41, %s3084_s19 }
 0x88a   : > { %1633 = vrot.lane.b32.xlu0 %v3324_v41, %s3086_s24 }
 0x8f9   : > { %v1525_v59 = vpop.xlane.xlu0 %1524 }
 0x8fa   : > { %2957 = vrcp.f32 %v1525_v59 }
 0x8fd   : > { %v1528_v60 = vpop.xlane.xlu0 %1527 }
 0x8fe   : > { %2959 = vrcp.f32 %v1528_v60 }
 0x901   : > { %v1536_v61 = vpop.permute.xlu0 %1535 }
 0x902   : > { %v1541_v62 = vsel %vm1095_vm4, %v1536_v61, 0 }
 0x903   : > { %2781 = vmatpush3.bf16.msra.mxu1 %v1541_v62  ;;  %v2921_v62 = vld [vmem:[%s3244_s17] sm:$0xff]  }
 0x904   : > { %v2958_v63 = vpop.eup %2957  ;;  %2792 = vmatprep.subr.bf16.mxu1 %v3075_v17 }
 0x905   : > { %v1531_v1 = vmul.f32 %v2958_v63, %v2954_v54  ;;  %v1634_v11 = vpop.permute.xlu0 %1633  ;;  %v2922_v63 = vld [vmem:[%s3244_s17 + $0x8] sm:$0xff]  }
 0x907   : > { %v1533_v4 = vpack.c.bf16 %v1531_v1, %v1531_v1 }
 0x908   : > { %v2960_v5 = vpop.eup %2959 }
 0x909   : > { %v1532_v6 = vmul.f32 %v2960_v5, %v2956_v57  ;;  %2783 = vmatmul.mubr.msk.bf16.vlgmr.msra.gmra.mrb[16].mxu1 %vm970_vm3, %v1533_v4 }
 0x90a   : > { %2794 = vmatprep.mubr.msk.bf16.mxu1 %vm3076_vm2, %v3075_v17 }
 0x90b   : > { %v1534_v9 = vpack.c.bf16 %v1532_v6, %v1532_v6 }
 0x90c   : > { %2793 = vmatpush3.bf16.xpose.msra.mxu1 %v1641_v8 }
 0x90d   : > { %2789 = vmatmul.mubr.msk.bf16.vlgmr.msra.gmra.mrb[28].mxu0 %vm970_vm3, %v1534_v9  ;;  %2804 = vmatprep.subr.bf16.mxu1 %v3075_v17 }
 0x90e   : > { %2799 = vmatpush3.bf16.xpose.msra.mxu0 %v1691_v10  ;;  %2800 = vmatprep.mubr.msk.bf16.mxu0 %vm3076_vm2, %v3075_v17 }
 0x90f   : > { %2810 = vmatprep.subr.bf16.mxu0 %v3075_v17 }
 0x913   : > { %2795 = vmatmul.mubr.msk.bf16.vlgmr.msra.gmra.mrb[20].mxu1 %vm970_vm3, %v1634_v11 }
 0x914   : > { %2806 = vmatprep.mubr.msk.bf16.mxu1 %vm3076_vm2, %v3075_v17 }
 0x915   : > { %2801 = vmatmul.mubr.msk.bf16.vlgmr.msra.gmra.mrb[32].mxu0 %vm970_vm3, %v1684_v12 }
 0x916   : > { %2812 = vmatprep.mubr.msk.bf16.mxu0 %vm3076_vm2, %v3075_v17 }
 0x9dc   : > { %v1577_v13 = vpop.f32.mrb[16].mxu1 }
 0x9dd   : > { %v2784_v14 = vpop.f32.mrb[17].mxu1  ;;  %v1631_v51 = vpack.c.bf16 %v1577_v13, %v1577_v13 }
 0x9de   : > { %v1580_v15 = vpop.f32.mrb[18].mxu1 }
 0x9df   : > { %v2785_v16 = vpop.f32.mrb[19].mxu1 }
 0x9e0   : > { %v1625_v18 = vpop.f32.mrb[28].mxu0  ;;  %v1187_v16 = vpack.c.bf16 %v3384_v30, %v3384_v30  ;;  %v2621_v30 = vld [vmem:[%s3692_s18] ss:$0 sm:$0xff]  ;;  %s3693_s18 = sld [smem:[#allocation17_spill]] (!%p2643_p6) }
 0x9e1   : > { %v2790_v19 = vpop.f32.mrb[29].mxu0  ;;  %v1632_v38 = vpack.c.bf16 %v1625_v18, %v1625_v18  ;;  %v1188_v18 = vpack.c.bf16 %v3386_v34, %v3386_v34 }
 0x9e2   : > { %v1628_v20 = vpop.f32.mrb[30].mxu0 }
 0x9e3   : > { %v2791_v22 = vpop.f32.mrb[31].mxu0 }
 0x9e6   : > { %v1677_v23 = vpop.f32.mrb[20].mxu1 }
 0x9e7   : > { %v1678_v24 = vadd.f32 %v3345_v49, %v1677_v23  ;;  %v2796_v26 = vpop.f32.mrb[21].mxu1  ;;  %v1409_v49 = vpack.c.bf16 %v3420_v21, %v3420_v21 }
 0x9e8   : > { %v1680_v27 = vpop.f32.mrb[22].mxu1  ;;  %v1727_v28 = vpop.f32.mrb[32].mxu0 }
 0x9e9   : > { %v1728_v29 = vadd.f32 %v3352_v56, %v1727_v28  ;;  %v2797_v31 = vpop.f32.mrb[23].mxu1  ;;  %v2802_v32 = vpop.f32.mrb[33].mxu0  ;;  %v1733_v33 = vsel %vm970_vm3, %v1678_v24, -inf  ;;  %v1410_v56 = vpack.c.bf16 %v3422_v25, %v3422_v25 }
 0x9ea   : > { %1734 = vmax.xlane.f32.xlu0 %v1733_v33  ;;  %v1730_v35 = vpop.f32.mrb[34].mxu0 }
 0x9eb   : > { %v2803_v36 = vpop.f32.mrb[35].mxu0  ;;  %v1736_v37 = vsel %vm970_vm3, %v1728_v29, -inf }
 0x9ec   : > { %1737 = vmax.xlane.f32.xlu1 %v1736_v37 }
 0x9fd   : > { %1805 = vrot.lane.b32.xlu1 %v3326_v44, %s3087_s26 }
 0xa01   : > { %1857 = vrot.lane.b32.xlu1 %v1409_v49, %s3088_s27 }
 0xa05   : > { %1859 = vrot.lane.b32.xlu1 %v1410_v56, %s3088_s27 }
 0xa09   : > { %1865 = vrot.lane.b32.xlu1 %v1632_v38, %s3089_s1 }
 0xa77   : > { %v1735_v39 = vpop.xlane.xlu0 %1734 }
 0xa78   : > { %v1739_v40 = vsub.f32 %v1678_v24, %v1735_v39 }
 0xa79   : > { %v1738_v42 = vpop.xlane.xlu1 %1737 }
 0xa7a   : > { %v1741_v43 = vmul.f32 1.442695, %v1739_v40  ;;  %v1740_v44 = vsub.f32 %v1728_v29, %v1738_v42 }
 0xa7c   : > { %2961 = vpow2.f32 %v1741_v43  ;;  %v1743_v45 = vmul.f32 1.442695, %v1740_v44 }
 0xa7d   : > { %v1806_v21 = vpop.permute.xlu1 %1805 }
 0xa7e   : > { %2963 = vpow2.f32 %v1743_v45  ;;  %v1811_v46 = vsel %vm1095_vm4, %v1806_v21, 0 }
 0xa7f   : > { %2811 = vmatpush3.bf16.msra.mxu0 %v1811_v46 }
 0xa80   : > { %2824 = vmatprep.subr.bf16.mxu0 %v3075_v17 }
 0xa81   : > { %v1858_v12 = vpop.permute.xlu1 %1857 }
 0xa82   : > { %v1875_v20 = vsel %vm970_vm3, %v1187_v16, %v1858_v12  ;;  %v2628_v12 = vld [vmem:[%s814_s6] ss:$0 sm:$0xff] }
 0xa85   : > { %v1860_v13 = vpop.permute.xlu1 %1859 }
 0xa86   : > { %v2962_v25 = vpop.eup %2961  ;;  %v1878_v22 = vsel %vm970_vm3, %v1188_v18, %v1860_v13 }
 0xa87   : > { %v1745_v47 = vsel %vm970_vm3, %v2962_v25, 0.0 }
 0xa88   : > { %v2964_v48 = vpop.eup %2963  ;;  %1746 = vadd.xlane.f32.xlu0 %v1745_v47  ;;  %v2924_v47 = vld [vmem:[%s3261_s4 + $0x8] sm:$0xff]  }
 0xa89   : > { %v1748_v50 = vsel %vm970_vm3, %v2964_v48, 0.0  ;;  %v1866_v15 = vpop.permute.xlu1 %1865 }
 0xa8a   : > { %v1883_v23 = vsel %vm1879_vm5, %v1878_v22, %v1866_v15 }
 0xa8c   : > { %1749 = vadd.xlane.f32.xlu0 %v1748_v50 }
 0xaa2   : > { %1757 = vrot.lane.b32.xlu0 %v3324_v41, %s3087_s26 }
 0xaa6   : > { %1863 = vrot.lane.b32.xlu0 %v1631_v51, %s3089_s1 }
 0xb15   : > { %v1747_v52 = vpop.xlane.xlu0 %1746 }
 0xb16   : > { %2965 = vrcp.f32 %v1747_v52 }
 0xb19   : > { %v1750_v53 = vpop.xlane.xlu0 %1749 }
 0xb1a   : > { %2967 = vrcp.f32 %v1750_v53 }
 0xb1d   : > { %v1758_v54 = vpop.permute.xlu0 %1757 }
 0xb1e   : > { %v1763_v55 = vsel %vm1095_vm4, %v1758_v54, 0 }
 0xb1f   : > { %2805 = vmatpush3.bf16.msra.mxu1 %v1763_v55 }
 0xb20   : > { %v2966_v57 = vpop.eup %2965  ;;  %2816 = vmatprep.subr.bf16.mxu1 %v3075_v17 }
 0xb21   : > { %v1753_v58 = vmul.f32 %v2966_v57, %v2962_v25  ;;  %v1864_v14 = vpop.permute.xlu0 %1863  ;;  %v2923_v25 = vld [vmem:[%s3261_s4] sm:$0xff]   ;;  %s3694_s4 = sld [smem:[#allocation18_spill]] (!%p2643_p6) }
 0xb22   : > { %v1881_v24 = vsel %vm1879_vm5, %v1875_v20, %v1864_v14 }
 0xb23   : > { %v1755_v59 = vpack.c.bf16 %v1753_v58, %v1753_v58  ;;  %v2626_v58 = vld [vmem:[%s803_s28] ss:$0 sm:$0xff] }
 0xb24   : > { %v2968_v60 = vpop.eup %2967 }
 0xb25   : > { %v1754_v41 = vmul.f32 %v2968_v60, %v2964_v48  ;;  %2807 = vmatmul.mubr.msk.bf16.vlgmr.msra.gmra.mrb[24].mxu1 %vm970_vm3, %v1755_v59 }
 0xb26   : > { %2820 = vmatprep.mubr.msk.bf16.mxu1 %vm3076_vm2, %v3075_v17  ;;  %2817 = vmatpush3.bf16.msra.mxu1 %v2921_v62 }
 0xb27   : > { %v1756_v61 = vpack.c.bf16 %v1754_v41, %v1754_v41  ;;  %2818 = vmatprep.subr.bf16.mxu1 %v3075_v17 }
 0xb29   : > { %2813 = vmatmul.mubr.msk.bf16.vlgmr.msra.gmra.mrb[36].mxu0 %vm970_vm3, %v1756_v61  ;;  %v2627_v61 = vld [vmem:[%s806_s30] ss:$0 sm:$0xff] }
 0xb2a   : > { %2828 = vmatprep.mubr.msk.bf16.mxu0 %vm3076_vm2, %v3075_v17  ;;  %2819 = vmatpush3.bf16.msra.mxu1 %v2922_v63 }
 0xb2b   : > { %2832 = vmatprep.subr.bf16.mxu1 %v3075_v17  ;;  %2825 = vmatpush3.bf16.msra.mxu0 %v2923_v25 }
 0xb2c   : > { %2826 = vmatprep.subr.bf16.mxu0 %v3075_v17 }
 0xb2f   : > { %2827 = vmatpush3.bf16.msra.mxu0 %v2924_v47 }
 0xbf8   : > { %v1799_v0 = vpop.f32.mrb[24].mxu1 }
 0xbf9   : > { %v1853_v1 = vpack.c.bf16 %v1799_v0, %v1799_v0  ;;  %v2808_v4 = vpop.f32.mrb[25].mxu1 }
 0xbfa   : > { %v1802_v5 = vpop.f32.mrb[26].mxu1  ;;  %v2925_v4 = vld [vmem:[%s3271_s3] sm:$0xff]  }
 0xbfb   : > { %1869 = vrot.lane.b32.xlu0 %v1853_v1, %s3090_s29  ;;  %v2809_v6 = vpop.f32.mrb[27].mxu1  ;;  %v2926_v5 = vld [vmem:[%s3271_s3 + $0x8] sm:$0xff]  }
 0xbfc   : > { %v1847_v7 = vpop.f32.mrb[36].mxu0  ;;  %v2927_v6 = vld [vmem:[%s3271_s3 + $0x10] sm:$0xff]  }
 0xbfd   : > { %v1854_v8 = vpack.c.bf16 %v1847_v7, %v1847_v7  ;;  %v2814_v9 = vpop.f32.mrb[37].mxu0  ;;  %v2928_v7 = vld [vmem:[%s3271_s3 + $0x18] sm:$0xff]  }
 0xbfe   : > { %v1850_v10 = vpop.f32.mrb[38].mxu0  ;;  %v2930_v9 = vld [vmem:[%s3271_s3 + $0x28] sm:$0xff]  }
 0xbff   : > { %1871 = vrot.lane.b32.xlu1 %v1854_v8, %s3090_s29  ;;  %v2815_v11 = vpop.f32.mrb[39].mxu0  ;;  %v2929_v8 = vld [vmem:[%s3271_s3 + $0x20] sm:$0xff]   ;;  %v2931_v10 = vld [vmem:[%s3271_s3 + $0x30] sm:$0xff]  }
 0xc00   : > { %v2932_v11 = vld [vmem:[%s3271_s3 + $0x38] sm:$0xff]  }
 0xc6d   : > { %v1870_v19 = vpop.permute.xlu0 %1869 }
 0xc6e   : > { %v1886_v27 = vsel %vm1884_vm6, %v1881_v24, %v1870_v19 }
 0xc71   : > { %v1872_v26 = vpop.permute.xlu1 %1871 }
 0xc72   : > { %v1888_v28 = vsel %vm1884_vm6, %v1883_v23, %v1872_v26 }
 0xc73   : > { %v2622_v29 = vcombine.low %v1886_v27, %v1888_v28 }
 0xc75   : > { %2821 = vmatmul.mubr.msk.bf16.vlgmr.msra.gmra.mrb[28].mxu1 %vm841_vm1, %v2622_v29 }
 0xc76   : > { %2848 = vmatprep.mubr.msk.bf16.mxu1 %vm3076_vm2, %v3075_v17  ;;  %2833 = vmatpush3.bf16.msra.mxu1 %v2925_v4 }
 0xc77   : > { %2834 = vmatprep.subr.bf16.mxu1 %v3075_v17 }
 0xc7a   : > { %2835 = vmatpush3.bf16.msra.mxu1 %v2926_v5 }
 0xc7b   : > { %2836 = vmatprep.subr.bf16.mxu1 %v3075_v17 }
 0xc7e   : > { %2837 = vmatpush3.bf16.msra.mxu1 %v2927_v6 }
 0xc7f   : > { %2838 = vmatprep.subr.bf16.mxu1 %v3075_v17 }
 0xc82   : > { %2839 = vmatpush3.bf16.msra.mxu1 %v2928_v7 }
 0xc83   : > { %2840 = vmatprep.subr.bf16.mxu1 %v3075_v17 }
 0xc86   : > { %2841 = vmatpush3.bf16.msra.mxu1 %v2929_v8 }
 0xc87   : > { %2842 = vmatprep.subr.bf16.mxu1 %v3075_v17 }
 0xc8a   : > { %2843 = vmatpush3.bf16.msra.mxu1 %v2930_v9 }
 0xc8b   : > { %2844 = vmatprep.subr.bf16.mxu1 %v3075_v17 }
 0xc8e   : > { %2845 = vmatpush3.bf16.msra.mxu1 %v2931_v10 }
 0xc8f   : > { %2846 = vmatprep.subr.bf16.mxu1 %v3075_v17 }
 0xc92   : > { %2847 = vmatpush3.bf16.msra.mxu1 %v2932_v11 }
 0xd48   : > { %v1954_v34 = vpop.f32.mrb[28].mxu1 }
 0xd49   : > { %v1955_v31 = vadd.f32 %v2621_v30, %v1954_v34  ;;  %v2822_v32 = vpop.f32.mrb[29].mxu1 }
 0xd4a   : > { %v1957_v33 = vpop.f32.mrb[30].mxu1 }
 0xd4b   : > { %v3501_v35 = vadd.f32 %v1955_v31, %v3284_v2  ;;  %v1958_v36 = vadd.f32 %v2621_v30, %v1957_v33  ;;  %v2823_v37 = vpop.f32.mrb[31].mxu1  ;;  %v2634_v33 = vld [vmem:[%s822_s21] ss:$0 sm:$0xff] }
 0xd4d   : > { %v3504_v49 = vadd.f32 %v1958_v36, %v3286_v3  ;;  %v1965_v56 = vsel %vm841_vm1, %v3501_v35, 0.0 }
 0xd4e   : > { %1966 = vadd.xlane.f32.xlu0 %v1965_v56 }
 0xd4f   : > { %v1968_v38 = vsel %vm841_vm1, %v3504_v49, 0.0 }
 0xd50   : > { %1969 = vadd.xlane.f32.xlu1 %v1968_v38 }
 0xddb   : > { %v1967_v39 = vpop.xlane.xlu0 %1966 }
 0xddc   : > { %v1971_v40 = vmul.f32 0.03125, %v1967_v39 }
 0xddd   : > { %v1970_v42 = vpop.xlane.xlu1 %1969 }
 0xdde   : > { %v1973_v2 = vsub.f32 %v3501_v35, %v1971_v40  ;;  %v1972_v43 = vmul.f32 0.03125, %v1970_v42 }
 0xde0   : > { %v1974_v44 = vsub.f32 %v3504_v49, %v1972_v43  ;;  %v1975_v3 = vmul.f32 %v1973_v2, %v1973_v2 }
 0xde2   : > { %v1977_v45 = vsel %vm841_vm1, %v1975_v3, 0.0  ;;  %v1976_v21 = vmul.f32 %v1974_v44, %v1974_v44 }
 0xde3   : > { %1978 = vadd.xlane.f32.xlu0 %v1977_v45 }
 0xde4   : > { %v1980_v46 = vsel %vm841_vm1, %v1976_v21, 0.0 }
 0xde7   : > { %1981 = vadd.xlane.f32.xlu0 %v1980_v46 }
 0xe70   : > { %v1979_v48 = vpop.xlane.xlu0 %1978 }
 0xe71   : > { %v1983_v50 = vmul.f32 0.03125, %v1979_v48 }
 0xe73   : > { %v1985_v51 = vadd.f32 1e-05, %v1983_v50 }
 0xe74   : > { %v1982_v52 = vpop.xlane.xlu0 %1981 }
 0xe75   : > { %2969 = vrsqrt.f32 %v1985_v51  ;;  %v1984_v53 = vmul.f32 0.03125, %v1982_v52  ;;  %v2981_v51 = vld [vmem:[%s3658_s16] sm:$0xff] (!%p2643_p6)   ;;  %v3091_v52 = vmov (!%p2643_p6), 0.0  }
 0xe76   : > { %2852 = vmatprep.subr.bf16.mxu0 (!%p2643_p6), %v3091_v52 }
 0xe77   : > { %v1986_v54 = vadd.f32 1e-05, %v1984_v53  ;;  %v2982_v53 = vld [vmem:[%s3658_s16 + $0x8] sm:$0xff] (!%p2643_p6)  }
 0xe79   : > { %2971 = vrsqrt.f32 %v1986_v54 }
 0xe7f   : > { %v2970_v55 = vpop.eup %2969 }
 0xe80   : > { %v1989_v57 = vmul.f32 %v2970_v55, %v1973_v2 }
 0xe82   : > { %v1997_v60 = vmul.f32 %v2626_v58, %v1989_v57 }
 0xe83   : > { %v2972_v59 = vpop.eup %2971 }
 0xe84   : > { %v1990_v41 = vmul.f32 %v2972_v59, %v1974_v44  ;;  %v2005_v63 = vadd.f32 %v2627_v61, %v1997_v60 }
 0xe86   : > { %v1998_v62 = vmul.f32 %v2626_v58, %v1990_v41 }
 0xe88   : > { %v2006_v0 = vadd.f32 %v2627_v61, %v1998_v62  ;;  %v2212_v61 = vld [vmem:[%s3656_s14] sm:$0x1] (!%p2643_p6) }
 0xe8a   : > { %v2007_v1 = vpack.c.bf16 %v2006_v0, %v2005_v63  ;;  %v2213_v63 = vld [vmem:[%s3693_s18] sm:$0x1] (!%p2643_p6) }
 0xe8c   : > { %2829 = vmatmul.mubr.msk.bf16.vlgmr.msra.gmra.mrb[40].mxu0 %vm841_vm1, %v2007_v1 }
 0xe8d   : > { %2856 = vmatprep.mubr.msk.bf16.mxu0 (!%p2643_p6), %vm3092_vm8, %v3091_v52  ;;  %2853 = vmatpush3.bf16.msra.mxu0 (!%p2643_p6), %v2981_v51 }
 0xe8e   : > { %2854 = vmatprep.subr.bf16.mxu0 (!%p2643_p6), %v3091_v52 }
 0xe91   : > { %2855 = vmatpush3.bf16.msra.mxu0 (!%p2643_p6), %v2982_v53 }
 0xf5f   : > { %v2068_v13 = vpop.f32.mrb[40].mxu0 }
 0xf60   : > { %v2069_v14 = vadd.f32 %v2628_v12, %v2068_v13  ;;  %v2830_v15 = vpop.f32.mrb[41].mxu0 }
 0xf61   : > { %v2071_v16 = vpop.f32.mrb[42].mxu0  ;;  %v2644_v15 = vld [vmem:[%s3694_s4] ss:$0 sm:$0xff] (!%p2643_p6) }
 0xf62   : > { %v2632_v18 = vmul.f32 -1.702, %v2069_v14  ;;  %v2072_v19 = vadd.f32 %v2628_v12, %v2071_v16  ;;  %v2831_v20 = vpop.f32.mrb[43].mxu0 }
 0xf64   : > { %v2079_v22 = vmul.f32 1.442695, %v2632_v18  ;;  %v2633_v23 = vmul.f32 -1.702, %v2072_v19 }
 0xf66   : > { %2973 = vpow2.f32 %v2079_v22  ;;  %v2081_v24 = vmul.f32 1.442695, %v2633_v23 }
 0xf68   : > { %2975 = vpow2.f32 %v2081_v24 }
 0xf70   : > { %v2974_v17 = vpop.eup %2973 }
 0xf71   : > { %v2083_v26 = vadd.f32 1.0, %v2974_v17 }
 0xf72   : > { %v2976_v27 = vpop.eup %2975 }
 0xf73   : > { %2977 = vrcp.f32 %v2083_v26  ;;  %v2084_v28 = vadd.f32 1.0, %v2976_v27  ;;  %v3093_v27 = vmov (!%p2643_p6), 1966171168  }
 0xf75   : > { %2979 = vrcp.f32 %v2084_v28  ;;  %v2331_v28 = vunpack.c.l.s4 (!%p2643_p6), %v3093_v27 }
 0xf7d   : > { %v2978_v29 = vpop.eup %2977 }
 0xf7e   : > { %v2089_v34 = vmul.f32 %v2978_v29, %v2069_v14  ;;  %v2333_v29 = vlaneseq (!%p2643_p6) }
 0xf7f   : > { %v2980_v30 = vpop.eup %2979 }
 0xf80   : > { %v2090_v31 = vmul.f32 %v2980_v30, %v2072_v19  ;;  %v2332_v30 = vunpack.c.0.s8 (!%p2643_p6), %v2331_v28 }
 0xf82   : > { %v2091_v32 = vpack.c.bf16 %v2090_v31, %v2089_v34  ;;  %v2334_v34 = vshrl.u32 (!%p2643_p6), %v2333_v29, 7 }
 0xf84   : > { %2849 = vmatmul.mubr.bf16.vlgmr.msra.gmra.mrb[32].mxu1 %v2091_v32  ;;  %v2335_v31 = vsub.s32 (!%p2643_p6), %v2332_v30, %v2334_v34 }
0x1057   : > { %v2197_v36 = vpop.f32.mrb[32].mxu1 }
0x1058   : > { %v2198_v37 = vadd.f32 %v2634_v33, %v2197_v36  ;;  %v2850_v56 = vpop.f32.mrb[33].mxu1  ;;  %2211 = sbr.rel (%p2643_p6) target bundleno = 4765 (0x129d), region = 100 }
0x1059   : > { %v2200_v38 = vpop.f32.mrb[34].mxu1 }
0x105a   : > { %v2204_v39 = vadd.f32 %v2198_v37, %v3501_v35  ;;  %v2201_v40 = vadd.f32 %v2634_v33, %v2200_v38  ;;  %v2851_v42 = vpop.f32.mrb[35].mxu1 }
0x105c   : > { %2206 = vst.msk [vmem:[#allocation2] sm:$0xff] %vm841_vm1, %v2204_v39  ;;  %v2205_v2 = vadd.f32 %v2201_v40, %v3504_v49  ;;  %v2215_v44 = vsel (!%p2643_p6), %vm2214_vm7, %v2204_v39, 0.0 }
0x105e   : > { %2207 = vst.msk [vmem:[#allocation2 + $0x8] sm:$0xff] %vm841_vm1, %v2205_v2  ;;  %v2218_v43 = vsel (!%p2643_p6), %vm2214_vm7, %v2205_v2, 0.0 }
0x105f   : > { %2219 = vadd.xlane.f32.xlu0 %v2218_v43 }
0x1063   : > { %2216 = vadd.xlane.f32.xlu0 %v2215_v44 }
0x10ec   : > { %v2220_v3 = vpop.xlane.xlu0 %2219 }
0x10ed   : > { %v2222_v35 = vmul.f32 0.03125, %v2220_v3 }
0x10ef   : > { %v2224_v45 = vsub.f32 %v2205_v2, %v2222_v35 }
0x10f0   : > { %v2217_v21 = vpop.xlane.xlu0 %2216 }
0x10f1   : > { %v2221_v46 = vmul.f32 0.03125, %v2217_v21  ;;  %v2226_v25 = vmul.f32 %v2224_v45, %v2224_v45 }
0x10f3   : > { %v2223_v47 = vsub.f32 %v2204_v39, %v2221_v46  ;;  %v2230_v49 = vsel %vm2214_vm7, %v2226_v25, 0.0 }
0x10f4   : > { %2231 = vadd.xlane.f32.xlu1 %v2230_v49 }
0x10f5   : > { %v2225_v48 = vmul.f32 %v2223_v47, %v2223_v47 }
0x10f7   : > { %v2227_v50 = vsel %vm2214_vm7, %v2225_v48, 0.0 }
0x10f8   : > { %2228 = vadd.xlane.f32.xlu1 %v2227_v50 }
0x1181   : > { %v2232_v54 = vpop.xlane.xlu1 %2231 }
0x1182   : > { %v2234_v55 = vmul.f32 0.03125, %v2232_v54 }
0x1184   : > { %v2236_v57 = vadd.f32 1e-05, %v2234_v55 }
0x1185   : > { %v2229_v58 = vpop.xlane.xlu1 %2228 }
0x1186   : > { %2983 = vrsqrt.f32 %v2236_v57  ;;  %v2233_v59 = vmul.f32 0.03125, %v2229_v58 }
0x1188   : > { %v2235_v60 = vadd.f32 1e-05, %v2233_v59 }
0x118a   : > { %2985 = vrsqrt.f32 %v2235_v60 }
0x1190   : > { %v2984_v41 = vpop.eup %2983 }
0x1191   : > { %v2240_v62 = vmul.f32 %v2984_v41, %v2224_v45 }
0x1193   : > { %v2242_v0 = vmul.f32 %v2240_v62, %v2212_v61 }
0x1194   : > { %v2986_v1 = vpop.eup %2985 }
0x1195   : > { %v2239_v4 = vmul.f32 %v2986_v1, %v2223_v47  ;;  %v2244_v5 = vadd.f32 %v2242_v0, %v2213_v63 }
0x1197   : > { %v2241_v6 = vmul.f32 %v2239_v4, %v2212_v61  ;;  %v2246_v7 = vpack.c.bf16 %v2244_v5, %v2244_v5 }
0x1199   : > { %v2243_v8 = vadd.f32 %v2241_v6, %v2213_v63  ;;  %v2261_v9 = vunpack.c.l.b16 %v2246_v7 }
0x119b   : > { %v2245_v10 = vpack.c.bf16 %v2243_v8, %v2243_v8  ;;  %v2262_v12 = vrot.slane %v2261_v9, 7 }
0x119d   : > { %v2260_v11 = vunpack.c.l.b16 %v2245_v10 }
0x119f   : > { %v2264_v13 = vsel %vm2263_vm9, %v2262_v12, %v2260_v11 }
0x11a0   : > { %v2265_v14 = vpack.c.b16 %v2264_v13, %v2264_v13 }
0x11a2   : > { %2857 = vmatmul.mubr.msk.bf16.vlgmr.msra.gmra.mrb[0].mxu0 %vm841_vm1, %v2265_v14 }
0x1275   : > { %v2315_v16 = vpop.f32.mrb[0].mxu0 }
0x1276   : > { %v2316_v18 = vadd.f32 %v2644_v15, %v2315_v16  ;;  %v2858_v19 = vpop.f32.mrb[1].mxu0 }
0x1277   : > { %v2318_v20 = vpop.f32.mrb[2].mxu0 }
0x1278   : > { %v2648_v22 = vmul.f32 -1.702, %v2316_v18  ;;  %v2859_v23 = vpop.f32.mrb[3].mxu0 }
0x127a   : > { %v2323_v24 = vmul.f32 1.442695, %v2648_v22 }
0x127c   : > { %2987 = vpow2.f32 %v2323_v24 }
0x1286   : > { %v2988_v17 = vpop.eup %2987 }
0x1287   : > { %v2325_v26 = vadd.f32 1.0, %v2988_v17 }
0x1289   : > { %2989 = vrcp.f32 %v2325_v26 }
0x1293   : > { %v2990_v32 = vpop.eup %2989 }
0x1294   : > { %v2328_v33 = vmul.f32 %v2990_v32, %v2316_v18 }
0x1296   : > { %v2336_v36 = vrot.slane %v2328_v33, %v2335_v31 }
0x1298   : > { %v2337_v37 = vcombine.high %v2336_v36, %v2336_v36  ;;  %v2344_v56 = vrot.slane %v2336_v36, %v2335_v31 }
0x129a   : > { %v2351_v38 = vrot.slane %v2337_v37, %v2335_v31  ;;  %2354 = vst.msk [vmem:[#allocation4] sm:$0x1] %vm2214_vm7, %v2344_v56 }
0x129c   : > { %2355 = vst.msk [vmem:[#allocation4 + $0x1] sm:$0x1] %vm2214_vm7, %v2351_v38 }
0x129d PF: > { %s3695_s20 = sld [smem:[#allocation9_spill]]  ;;  %s3094_s6 = smov [#allocation2]  }
0x129e   : > { %s2365_s3 = sshll.u32 %s3094_s6, 4  ;;  %s3095_s0 = smov [#allocation4]   ;;  %s2366_s3 = int_to_ptr.vmem [resolvable:$true] %s2365_s3 }
0x129f   : > { %s2381_s22 = sshll.u32 %s3095_s0, 4  ;;  %s2991_s21 = scalar_lea.vmem %s2366_s3, 256  ;;  %s2382_s22 = int_to_ptr.vmem [resolvable:$true] %s2381_s22 }
0x12a0   : > { %p2992_p8 = scmp.ne.s32.totalorder %s2366_s3, %s2991_s21  ;;  %p2998_p11 = scmp.lt.s32.totalorder %s2366_s3, %s2366_s3 }
0x12a1   : > { %p2999_p12 = scmp.lt.s32.totalorder %s2991_s21, %s2991_s21 }
0x12a3   : > { %s3696_s30 = sadd.s32 4294967295, %s3695_s20   ;;  %p3000_p13 = por %p2999_p12, %p2998_p11 }
0x12a4   : > { %p3582_p7 = scmp.eq.s32.totalorder %s3696_s30, 1 }
0x12a6   : > { %p2993_p9 = pnand %p2992_p8, %p3582_p7 }
0x12a8   : > { %p2994_p10 = pneg %p2993_p9 }
0x12aa   : > { %p3001_p0 = pnand %p3000_p13, %p2994_p10 }
0x12ac   : > { %3004 = shalt.err (!%p3001_p0)
}
0x12ad   : > { %s3698_s29 = sld [smem:[#allocation19_spill]] }
0x12b3   : > { %s3005_s17 = scalar_lea.hbm %s3698_s29, 256 }
0x12b4   : > { %p3006_p1 = scmp.ne.s32.totalorder %s3698_s29, %s3005_s17  ;;  %p3011_p4 = scmp.lt.u32.totalorder %s3005_s17, %s3698_s29 }
0x12b6   : > { %p3007_p2 = pnand %p3006_p1, %p3582_p7 }
0x12b8   : > { %p3008_p3 = pneg %p3007_p2 }
0x12ba   : > { %p3013_p5 = pnand %p3011_p4, %p3008_p3 }
0x12bc   : > { %3016 = shalt.err (!%p3013_p5)
}
0x12bd   : > { %s3096_s4 = smov 128   ;;  %s3017_s6 = scalar_lea.vmem %s2382_s22, 32 }
0x12be   : > { %2861 = dma.vmem_to_hbm [thread:$0]  (%p3582_p7), %s2366_s3, 256, %s3698_s29, [#allocation3], %s3096_s4, %s3096_s4, %s3088_s27  }
0x12bf   : > { %p3018_p6 = scmp.ne.s32.totalorder %s2382_s22, %s3017_s6  ;;  %p3024_p10 = scmp.lt.s32.totalorder %s2382_s22, %s2382_s22 }
0x12c0   : > { %p3025_p11 = scmp.lt.s32.totalorder %s3017_s6, %s3017_s6 }
0x12c1   : > { %p3019_p8 = pnand %p3018_p6, %p3582_p7 }
0x12c2   : > { %p3026_p12 = por %p3025_p11, %p3024_p10 }
0x12c3   : > { %p3020_p9 = pneg %p3019_p8 }
0x12c5   : > { %p3027_p13 = pnand %p3026_p12, %p3020_p9 }
0x12c7   : > { %3030 = shalt.err (!%p3027_p13)
}
0x12c8   : > { %s3699_s24 = sld [smem:[#allocation20_spill]] }
0x12ce   : > { %s3031_s26 = scalar_lea.hbm %s3699_s24, 32 }
0x12cf   : > { %p3032_p0 = scmp.ne.s32.totalorder %s3699_s24, %s3031_s26  ;;  %p3037_p3 = scmp.lt.u32.totalorder %s3031_s26, %s3699_s24 }
0x12d1   : > { %p3033_p1 = pnand %p3032_p0, %p3582_p7 }
0x12d3   : > { %p3034_p2 = pneg %p3033_p1 }
0x12d5   : > { %p3039_p4 = pnand %p3037_p3, %p3034_p2 }
0x12d7   : > { %3042 = shalt.err (!%p3039_p4)
}
0x12d8   : > { %s3097_s18 = smov 1  }
0x12d9   : > { %2863 = dma.vmem_to_hbm [thread:$0]  (%p3582_p7), %s2382_s22, 32, %s3699_s24, [#allocation5], %s3089_s1, %s3089_s1, %s3097_s18  }
0x12da   : > { %3056 = dma.done.wait (%p3582_p7), [#allocation3], 256  }
0x12db   : > { %3058 = vsyncadd (%p3582_p7), [#allocation3], 4294967040 }
0x12dc   : > { %3060 = dma.done.wait (%p3582_p7), [#allocation5], 32  }
0x12dd   : > { %3062 = vsyncadd (%p3582_p7), [#allocation5], 4294967264 }
0x12de PF: > { %s3700_s4 = sld [smem:[#allocation9_spill]]  ;;  %s3701_s0 = sld [smem:[#allocation8_spill]] }
0x12df   : > { %s3702_s30 = sld [smem:[#allocation10_spill]] }
0x12e4   : > { %s32_s20 = sadd.s32 1, %s3700_s4  }
0x12e5   : > { %p29_p5 = scmp.ge.s32.totalorder %s32_s20, 4  }
0x12e7   :  { %31 = sbr.rel (!%p29_p5) target bundleno = 14 (0xe), region = 176 }
0x12ee   :  { %2401 = vsyncpa [#allocation3], 1 }
0x12ef   :  { %2403 = vsyncpa [#allocation3 + $0x1], 1 }
0x12f0   :  { %2404 = vsyncpa [#allocation5], 1 }

</bundles_post_ra>
